<compile_context>
chip_gen: v6e
topology: v6e:2x2x1
jax: 0.10.0
libtpu: 0.0.40
codegen_flags: <defaults>
</compile_context>

<pallas_src>
import math
import functools

import jax
import jax.numpy as jnp
from jax.experimental import pallas as pl
from jax.experimental.pallas import tpu as pltpu

NEG_INF = -1e30  # large negative instead of -inf; combined with the post-softmax zeroing and
                 # the denominator guard this reproduces masked_fill(-inf) -> softmax ->
                 # masked_fill(0) exactly, including fully-masked rows (all-zero, as in torch).


def _mha_kernel(q_ref, k_ref, v_ref, mask_ref,
                wq_ref, bq_ref, wk_ref, bk_ref, wv_ref, bv_ref,
                wr_ref, br_ref, wfc_ref, bfc_ref, gamma_ref, beta_ref,
                out_ref, *attn_refs,
                n_head, d_k_head, d_v_head, matmul_dtype, approx_recip):
    bt, a, d_model = q_ref.shape
    o = k_ref.shape[1]
    dv_total = n_head * d_v_head

    q2 = q_ref[...].reshape(bt * a, d_model)               # [BT*A, D]
    k2 = k_ref[...].reshape(bt * o, d_model)               # [BT*O, D]
    v2 = v_ref[...].reshape(bt * o, d_model)               # [BT*O, D]
    # Integer-domain mask compare (no int8->f32 cast over the block).
    valid = (mask_ref[...] != 0)[:, None, :, :]            # [BT, 1, A, O] bool

    def proj(x, w_ref, b_ref):
        return jnp.dot(x.astype(matmul_dtype), w_ref[...].astype(matmul_dtype),
                       preferred_element_type=jnp.float32) + b_ref[...]

    # Projections (weights already [in, out]; no in-kernel weight transposes).
    qh = proj(q2, wq_ref, bq_ref)                          # [BT*A, dk_total]
    rr = proj(q2, wr_ref, br_ref)                          # [BT*A, dv_total]
    kh = proj(k2, wk_ref, bk_ref)                          # [BT*O, dk_total]
    vh = proj(v2, wv_ref, bv_ref)                          # [BT*O, dv_total]

    # Merge heads into the single leading batch dim of the MXU contractions.
    q4 = qh.reshape(bt, a, n_head, d_k_head).transpose(0, 2, 1, 3).reshape(bt * n_head, a, d_k_head)
    k4 = kh.reshape(bt, o, n_head, d_k_head).transpose(0, 2, 1, 3).reshape(bt * n_head, o, d_k_head)
    v4 = vh.reshape(bt, o, n_head, d_v_head).transpose(0, 2, 1, 3).reshape(bt * n_head, o, d_v_head)

    scale = 1.0 / math.sqrt(d_k_head)
    s = jnp.einsum('zak,zok->zao', q4.astype(matmul_dtype), k4.astype(matmul_dtype),
                   preferred_element_type=jnp.float32) * scale
    s = s.reshape(bt, n_head, a, o)

    # masked_fill(-inf) -> softmax -> masked_fill(0); fully-masked rows become all zeros.
    s = jnp.where(valid, s, NEG_INF)
    m = jnp.max(s, axis=-1, keepdims=True)
    p = jnp.where(valid, jnp.exp(s - m), 0.0)
    denom = jnp.sum(p, axis=-1, keepdims=True)
    denom = jnp.where(denom > 0.0, denom, 1.0)
    inv = pl.reciprocal(denom, approx=True) if approx_recip else 1.0 / denom
    attn = p * inv                                          # [BT, H, A, O] f32

    if attn_refs:   # optional output: lane-dense [BT, A, H*O] slab
        attn_refs[0][...] = attn.transpose(0, 2, 1, 3).reshape(bt, a, n_head * o)

    # Attention context, heads still merged into the batch dim.
    ctx = jnp.einsum('zao,zov->zav',
                     attn.reshape(bt * n_head, a, o).astype(matmul_dtype),
                     v4.astype(matmul_dtype),
                     preferred_element_type=jnp.float32)    # [BT*H, A, dvh]
    ctx = ctx.reshape(bt, n_head, a, d_v_head).transpose(0, 2, 1, 3).reshape(bt * a, dv_total)

    # Gated output projection: one [BT*A, dv_total] @ [dv_total, D] matmul.
    y = jnp.dot((ctx * rr).astype(matmul_dtype), wfc_ref[...].astype(matmul_dtype),
                preferred_element_type=jnp.float32) + bfc_ref[...]

    # Residual + LayerNorm (eps = 1e-5, PyTorch default).
    y = y + q2
    mu = jnp.mean(y, axis=-1, keepdims=True)
    var = jnp.mean((y - mu) ** 2, axis=-1, keepdims=True)
    yn = (y - mu) * jax.lax.rsqrt(var + 1e-5)
    out_ref[...] = (yn * gamma_ref[...] + beta_ref[...]).reshape(bt, a, d_model)


def _pick_vmem_limit_bytes():
    """Generation-aware scoped-VMEM limit (v7x parts have 64 MiB physical, others 128 MiB)."""
    kind = ""
    try:
        kind = jax.devices()[0].device_kind.lower()
    except Exception:  # pragma: no cover - defensive; fall through to conservative default
        pass
    is_small_vmem = ("v7" in kind) or ("tpu7" in kind) or ("7x" in kind) or (kind == "")
    physical = (64 << 20) if is_small_vmem else (128 << 20)
    return int(physical * 0.75)   # leave headroom below physical


def _vmem_bytes_per_step(bb, *, A, O, D, dk_total, dv_total, n_head, with_attn, weight_bytes):
    """Rough per-grid-step VMEM footprint estimate used to size block_b."""
    f4 = 4
    io = (bb * A * D * f4                     # q block
          + 2 * bb * O * D * f4               # k, v blocks
          + bb * A * O * 1                    # int8 mask block
          + bb * A * D * f4                   # out block
          + (bb * A * n_head * O * f4 if with_attn else 0))
    pipelined = 2 * (io + weight_bytes)       # BlockSpec double-buffering
    live = f4 * (bb * A * (dk_total + 2 * dv_total)     # qh, rr, ctx
                 + bb * O * (dk_total + dv_total)       # kh, vh
                 + 4 * bb * n_head * A * O              # s, p, attn (+ transposed copy)
                 + 3 * bb * A * D)                      # y, yn, normalized
    return pipelined + 2 * live               # 2x headroom for relayout temporaries


def _pick_block_b(B, est_fn, vmem_budget, cap=32):
    """Largest divisor of B whose estimated footprint fits; keep >= 2 grid steps when B >= 2
    so the grid can shard across both v7x TensorCores and pipelining has something to overlap."""
    best = 1
    for bb in range(1, min(B, cap) + 1):
        if B % bb:
            continue
        if B >= 2 and B // bb < 2:
            continue
        if est_fn(bb) <= vmem_budget:
            best = bb
    return best


def multi_head_attention(q, k, v, mask, params, n_head, *,
                         block_b=None, return_attn=True, attn_layout="hbao",
                         matmul_dtype=jnp.float32, approx_recip=False):
    assert attn_layout in ("hbao", "dense")
    B, A, D = q.shape
    O = k.shape[1]
    wq, bq, wk, bk, wv, bv, wr, br, wfc, bfc, gamma, beta = params
    dk_total = wq.shape[0]
    dv_total = wv.shape[0]
    d_k_head = dk_total // n_head
    d_v_head = dv_total // n_head

    # Host-side layout plumbing (one-time): weights to [in, out]; vectors to [1, n].
    wqT, wkT, wvT, wrT, wfcT = wq.T, wk.T, wv.T, wr.T, wfc.T
    bq2, bk2, bv2, br2 = (x.reshape(1, -1) for x in (bq, bk, bv, br))
    bfc2, gamma2, beta2 = bfc.reshape(1, -1), gamma.reshape(1, -1), beta.reshape(1, -1)
    # (mask != 0) keeps the torch semantics even for fractional mask values; int8 quarters DMA.
    mask_i8 = (mask != 0).astype(jnp.int8)

    weights = (wqT, bq2, wkT, bk2, wvT, bv2, wrT, br2, wfcT, bfc2, gamma2, beta2)
    weight_bytes = sum(int(w.size) * w.dtype.itemsize for w in weights)

    vmem_limit = _pick_vmem_limit_bytes()
    est = functools.partial(_vmem_bytes_per_step, A=A, O=O, D=D, dk_total=dk_total,
                            dv_total=dv_total, n_head=n_head, with_attn=return_attn,
                            weight_bytes=weight_bytes)
    if block_b is None:
        block_b = _pick_block_b(B, est, int(vmem_limit * 0.85))
    assert B % block_b == 0

    def const2d(arr):
        return pl.BlockSpec(arr.shape, lambda b: (0, 0))

    in_specs = [
        pl.BlockSpec((block_b, A, D), lambda b: (b, 0, 0)),   # q
        pl.BlockSpec((block_b, O, D), lambda b: (b, 0, 0)),   # k
        pl.BlockSpec((block_b, O, D), lambda b: (b, 0, 0)),   # v
        pl.BlockSpec((block_b, A, O), lambda b: (b, 0, 0)),   # mask (int8)
    ] + [const2d(w) for w in weights]

    out_spec_main = pl.BlockSpec((block_b, A, D), lambda b: (b, 0, 0))
    out_shape_main = jax.ShapeDtypeStruct((B, A, D), jnp.float32)
    if return_attn:
        out_specs = [out_spec_main,
                     pl.BlockSpec((block_b, A, n_head * O), lambda b: (b, 0, 0))]
        out_shape = [out_shape_main,
                     jax.ShapeDtypeStruct((B, A, n_head * O), jnp.float32)]
    else:
        out_specs = out_spec_main
        out_shape = out_shape_main

    kernel = functools.partial(_mha_kernel, n_head=n_head, d_k_head=d_k_head,
                               d_v_head=d_v_head, matmul_dtype=matmul_dtype,
                               approx_recip=approx_recip)

    result = pl.pallas_call(
        kernel,
        grid=(B // block_b,),
        in_specs=in_specs,
        out_specs=out_specs,
        out_shape=out_shape,
        compiler_params=pltpu.CompilerParams(
            dimension_semantics=("parallel",),
            vmem_limit_bytes=int(vmem_limit)),
    )(q, k, v, mask_i8, *weights)

    if not return_attn:
        return result
    out, attn_dense = result
    if attn_layout == "dense":
        return out, attn_dense                   # lane-dense [B, A, H*O] slab
    attn = attn_dense.reshape(B, A, n_head, O).transpose(2, 0, 1, 3)   # torch 'h b a o'
    return out, attn


def init_params(key, d_model, n_head, d_k, d_v):
    """Deterministic synthetic init matching the module's __init__ shapes / init schemes."""
    dk_total = int(d_k / n_head) * n_head
    dv_total = int(d_v / n_head) * n_head
    ks = jax.random.split(key, 10)
    std_qk = math.sqrt(2.0 / (d_model + d_k))
    std_v = math.sqrt(2.0 / (d_model + d_v))
    wq = std_qk * jax.random.normal(ks[0], (dk_total, d_model), jnp.float32)
    wk = std_qk * jax.random.normal(ks[1], (dk_total, d_model), jnp.float32)
    wv = std_v * jax.random.normal(ks[2], (dv_total, d_model), jnp.float32)
    wr = std_v * jax.random.normal(ks[3], (dv_total, d_model), jnp.float32)
    bb = 1.0 / math.sqrt(d_model)
    bq = jax.random.uniform(ks[4], (dk_total,), jnp.float32, -bb, bb)
    bk = jax.random.uniform(ks[5], (dk_total,), jnp.float32, -bb, bb)
    bv = jax.random.uniform(ks[6], (dv_total,), jnp.float32, -bb, bb)
    br = jax.random.uniform(ks[7], (dv_total,), jnp.float32, -bb, bb)
    std_fc = math.sqrt(2.0 / (dv_total + d_model))          # xavier_normal_
    wfc = std_fc * jax.random.normal(ks[8], (d_model, dv_total), jnp.float32)
    bfc_b = 1.0 / math.sqrt(dv_total)
    bfc = jax.random.uniform(ks[9], (d_model,), jnp.float32, -bfc_b, bfc_b)
    gamma = jnp.ones((d_model,), jnp.float32)
    beta = jnp.zeros((d_model,), jnp.float32)
    return (wq, bq, wk, bk, wv, bv, wr, br, wfc, bfc, gamma, beta)


def reference(q, k, v, mask, params, n_head):
    """Pure-JAX reference reproducing the torch forward."""
    wq, bq, wk, bk, wv, bv, wr, br, wfc, bfc, gamma, beta = params
    B, A, D = q.shape
    O = k.shape[1]
    dkh = wq.shape[0] // n_head
    dvh = wv.shape[0] // n_head
    residual = q
    r = q @ wr.T + br
    qp = (q @ wq.T + bq).reshape(B, A, n_head, dkh).transpose(2, 0, 1, 3)
    kp = (k @ wk.T + bk).reshape(B, O, n_head, dkh).transpose(2, 0, 1, 3)
    vp = (v @ wv.T + bv).reshape(B, O, n_head, dvh).transpose(2, 0, 1, 3)
    attn = jnp.einsum('hbak,hbok->hbao', qp, kp) / math.sqrt(dkh)
    valid = (mask != 0.0)[None]
    attn = jnp.where(valid, attn, NEG_INF)
    m = jnp.max(attn, axis=-1, keepdims=True)
    p = jnp.where(valid, jnp.exp(attn - m), 0.0)
    denom = jnp.sum(p, axis=-1, keepdims=True)
    attn = p / jnp.where(denom > 0.0, denom, 1.0)
    out = jnp.einsum('hbao,hbov->hbav', attn, vp)
    out = out.transpose(1, 2, 0, 3).reshape(B, A, n_head * dvh)
    out = (out * r) @ wfc.T + bfc
    y = out + residual
    mu = jnp.mean(y, axis=-1, keepdims=True)
    var = jnp.mean((y - mu) ** 2, axis=-1, keepdims=True)
    y = (y - mu) / jnp.sqrt(var + 1e-5) * gamma + beta
    return y, attn


if __name__ == "__main__":
    B, A, O = 2, 8, 8
    d_model, n_head, d_k, d_v = 32, 4, 32, 32

    key = jax.random.PRNGKey(0)
    kq, kk, kv, km, kp = jax.random.split(key, 5)
    q = jax.random.normal(kq, (B, A, d_model), jnp.float32)
    k = jax.random.normal(kk, (B, O, d_model), jnp.float32)
    v = jax.random.normal(kv, (B, O, d_model), jnp.float32)
    mask = jax.random.bernoulli(km, 0.7, (B, A, O)).astype(jnp.float32)
    mask = mask.at[0, 3, :].set(0.0)   # exercise full-row masking
    params = init_params(kp, d_model, n_head, d_k, d_v)

    # Full path: output + attention probabilities (torch 'h b a o' layout).
    out, attn = multi_head_attention(q, k, v, mask, params, n_head)
    out = jax.block_until_ready(out)
    attn = jax.block_until_ready(attn)

    # Fast path: attention output only (no attn writeback).
    out_only = jax.block_until_ready(
        multi_head_attention(q, k, v, mask, params, n_head, return_attn=False))

    out_ref, attn_ref = reference(q, k, v, mask, params, n_head)
    assert out.shape == (B, A, d_model) and attn.shape == (n_head, B, A, O)
    assert jnp.all(jnp.isfinite(out)) and jnp.all(jnp.isfinite(attn))
    assert jnp.allclose(out, out_ref, rtol=2e-2, atol=2e-2)
    assert jnp.allclose(attn, attn_ref, rtol=2e-2, atol=2e-2)
    assert jnp.allclose(out_only, out_ref, rtol=2e-2, atol=2e-2)
    print("KERNEL_OK")
</pallas_src>

<mosaic_0001>
module attributes {stable_mosaic.version = 11 : i64} {
  func.func @_mha_kernel(%arg0: i32, %arg1: memref<1x8x32xf32, #tpu.memory_space<vmem>>, %arg2: memref<1x8x32xf32, #tpu.memory_space<vmem>>, %arg3: memref<1x8x32xf32, #tpu.memory_space<vmem>>, %arg4: memref<1x8x8xi8, #tpu.memory_space<vmem>>, %arg5: memref<32x32xf32, #tpu.memory_space<vmem>>, %arg6: memref<1x32xf32, #tpu.memory_space<vmem>>, %arg7: memref<32x32xf32, #tpu.memory_space<vmem>>, %arg8: memref<1x32xf32, #tpu.memory_space<vmem>>, %arg9: memref<32x32xf32, #tpu.memory_space<vmem>>, %arg10: memref<1x32xf32, #tpu.memory_space<vmem>>, %arg11: memref<32x32xf32, #tpu.memory_space<vmem>>, %arg12: memref<1x32xf32, #tpu.memory_space<vmem>>, %arg13: memref<32x32xf32, #tpu.memory_space<vmem>>, %arg14: memref<1x32xf32, #tpu.memory_space<vmem>>, %arg15: memref<1x32xf32, #tpu.memory_space<vmem>>, %arg16: memref<1x32xf32, #tpu.memory_space<vmem>>, %arg17: memref<1x8x32xf32, #tpu.memory_space<vmem>>, %arg18: memref<1x8x32xf32, #tpu.memory_space<vmem>>) attributes {dimension_semantics = [#tpu.dimension_semantics<parallel>], iteration_bounds = array<i64: 2>, scalar_prefetch = 0 : i64, scratch_operands = 0 : i64, tpu.core_type = #tpu.core_type<tc>, window_params = [{transform_indices = @transform_0, window_bounds = array<i64: 1, 8, 32>}, {transform_indices = @transform_1, window_bounds = array<i64: 1, 8, 32>}, {transform_indices = @transform_2, window_bounds = array<i64: 1, 8, 32>}, {transform_indices = @transform_3, window_bounds = array<i64: 1, 8, 8>}, {pipeline_mode = #tpu.pipeline_mode<synchronous>, transform_indices = @transform_4, window_bounds = array<i64: 32, 32>}, {pipeline_mode = #tpu.pipeline_mode<synchronous>, transform_indices = @transform_5, window_bounds = array<i64: 1, 32>}, {pipeline_mode = #tpu.pipeline_mode<synchronous>, transform_indices = @transform_6, window_bounds = array<i64: 32, 32>}, {pipeline_mode = #tpu.pipeline_mode<synchronous>, transform_indices = @transform_7, window_bounds = array<i64: 1, 32>}, {pipeline_mode = #tpu.pipeline_mode<synchronous>, transform_indices = @transform_8, window_bounds = array<i64: 32, 32>}, {pipeline_mode = #tpu.pipeline_mode<synchronous>, transform_indices = @transform_9, window_bounds = array<i64: 1, 32>}, {pipeline_mode = #tpu.pipeline_mode<synchronous>, transform_indices = @transform_10, window_bounds = array<i64: 32, 32>}, {pipeline_mode = #tpu.pipeline_mode<synchronous>, transform_indices = @transform_11, window_bounds = array<i64: 1, 32>}, {pipeline_mode = #tpu.pipeline_mode<synchronous>, transform_indices = @transform_12, window_bounds = array<i64: 32, 32>}, {pipeline_mode = #tpu.pipeline_mode<synchronous>, transform_indices = @transform_13, window_bounds = array<i64: 1, 32>}, {pipeline_mode = #tpu.pipeline_mode<synchronous>, transform_indices = @transform_14, window_bounds = array<i64: 1, 32>}, {pipeline_mode = #tpu.pipeline_mode<synchronous>, transform_indices = @transform_15, window_bounds = array<i64: 1, 32>}, {transform_indices = @transform_16, window_bounds = array<i64: 1, 8, 32>}, {transform_indices = @transform_17, window_bounds = array<i64: 1, 8, 32>}]} {
    %c0 = arith.constant 0 : index
    %c0_0 = arith.constant 0 : index
    %c0_1 = arith.constant 0 : index
    %0 = vector.load %arg1[%c0, %c0_0, %c0_1] : memref<1x8x32xf32, #tpu.memory_space<vmem>>, vector<1x8x32xf32>
    %1 = vector.shape_cast %0 : vector<1x8x32xf32> to vector<8x32xf32>
    %c0_2 = arith.constant 0 : index
    %c0_3 = arith.constant 0 : index
    %c0_4 = arith.constant 0 : index
    %2 = vector.load %arg2[%c0_2, %c0_3, %c0_4] : memref<1x8x32xf32, #tpu.memory_space<vmem>>, vector<1x8x32xf32>
    %3 = vector.shape_cast %2 : vector<1x8x32xf32> to vector<8x32xf32>
    %c0_5 = arith.constant 0 : index
    %c0_6 = arith.constant 0 : index
    %c0_7 = arith.constant 0 : index
    %4 = vector.load %arg3[%c0_5, %c0_6, %c0_7] : memref<1x8x32xf32, #tpu.memory_space<vmem>>, vector<1x8x32xf32>
    %5 = vector.shape_cast %4 : vector<1x8x32xf32> to vector<8x32xf32>
    %c0_8 = arith.constant 0 : index
    %c0_9 = arith.constant 0 : index
    %c0_10 = arith.constant 0 : index
    %6 = vector.load %arg4[%c0_8, %c0_9, %c0_10] : memref<1x8x8xi8, #tpu.memory_space<vmem>>, vector<1x8x8xi8>
    %c0_i8 = arith.constant 0 : i8
    %7 = vector.broadcast %c0_i8 : i8 to vector<1x8x8xi8>
    %8 = arith.cmpi ne, %6, %7 : vector<1x8x8xi8>
    %9 = vector.shape_cast %8 : vector<1x8x8xi1> to vector<1x1x8x8xi1>
    %c0_11 = arith.constant 0 : index
    %c0_12 = arith.constant 0 : index
    %10 = vector.load %arg5[%c0_11, %c0_12] : memref<32x32xf32, #tpu.memory_space<vmem>>, vector<32x32xf32>
    %cst = arith.constant dense<0.000000e+00> : vector<8x32xf32>
    %11 = tpu.matmul %1, %10, %cst {dimension_numbers = #tpu.dot_dimension_numbers<[1], [0], [0], [1], [0, 0, 1, 1], [], []>} : vector<8x32xf32>, vector<32x32xf32>, vector<8x32xf32> -> vector<8x32xf32>
    %c0_13 = arith.constant 0 : index
    %c0_14 = arith.constant 0 : index
    %12 = vector.load %arg6[%c0_13, %c0_14] : memref<1x32xf32, #tpu.memory_space<vmem>>, vector<1x32xf32>
    %13 = vector.broadcast %12 : vector<1x32xf32> to vector<8x32xf32>
    %14 = arith.addf %11, %13 : vector<8x32xf32>
    %c0_15 = arith.constant 0 : index
    %c0_16 = arith.constant 0 : index
    %15 = vector.load %arg11[%c0_15, %c0_16] : memref<32x32xf32, #tpu.memory_space<vmem>>, vector<32x32xf32>
    %cst_17 = arith.constant dense<0.000000e+00> : vector<8x32xf32>
    %16 = tpu.matmul %1, %15, %cst_17 {dimension_numbers = #tpu.dot_dimension_numbers<[1], [0], [0], [1], [0, 0, 1, 1], [], []>} : vector<8x32xf32>, vector<32x32xf32>, vector<8x32xf32> -> vector<8x32xf32>
    %c0_18 = arith.constant 0 : index
    %c0_19 = arith.constant 0 : index
    %17 = vector.load %arg12[%c0_18, %c0_19] : memref<1x32xf32, #tpu.memory_space<vmem>>, vector<1x32xf32>
    %18 = vector.broadcast %17 : vector<1x32xf32> to vector<8x32xf32>
    %19 = arith.addf %16, %18 : vector<8x32xf32>
    %c0_20 = arith.constant 0 : index
    %c0_21 = arith.constant 0 : index
    %20 = vector.load %arg7[%c0_20, %c0_21] : memref<32x32xf32, #tpu.memory_space<vmem>>, vector<32x32xf32>
    %cst_22 = arith.constant dense<0.000000e+00> : vector<8x32xf32>
    %21 = tpu.matmul %3, %20, %cst_22 {dimension_numbers = #tpu.dot_dimension_numbers<[1], [0], [0], [1], [0, 0, 1, 1], [], []>} : vector<8x32xf32>, vector<32x32xf32>, vector<8x32xf32> -> vector<8x32xf32>
    %c0_23 = arith.constant 0 : index
    %c0_24 = arith.constant 0 : index
    %22 = vector.load %arg8[%c0_23, %c0_24] : memref<1x32xf32, #tpu.memory_space<vmem>>, vector<1x32xf32>
    %23 = vector.broadcast %22 : vector<1x32xf32> to vector<8x32xf32>
    %24 = arith.addf %21, %23 : vector<8x32xf32>
    %c0_25 = arith.constant 0 : index
    %c0_26 = arith.constant 0 : index
    %25 = vector.load %arg9[%c0_25, %c0_26] : memref<32x32xf32, #tpu.memory_space<vmem>>, vector<32x32xf32>
    %cst_27 = arith.constant dense<0.000000e+00> : vector<8x32xf32>
    %26 = tpu.matmul %5, %25, %cst_27 {dimension_numbers = #tpu.dot_dimension_numbers<[1], [0], [0], [1], [0, 0, 1, 1], [], []>} : vector<8x32xf32>, vector<32x32xf32>, vector<8x32xf32> -> vector<8x32xf32>
    %c0_28 = arith.constant 0 : index
    %c0_29 = arith.constant 0 : index
    %27 = vector.load %arg10[%c0_28, %c0_29] : memref<1x32xf32, #tpu.memory_space<vmem>>, vector<1x32xf32>
    %28 = vector.broadcast %27 : vector<1x32xf32> to vector<8x32xf32>
    %29 = arith.addf %26, %28 : vector<8x32xf32>
    %30 = vector.shape_cast %14 : vector<8x32xf32> to vector<1x8x4x8xf32>
    %31 = tpu.transpose %30, [0, 2, 1, 3] : vector<1x8x4x8xf32> -> vector<1x4x8x8xf32>
    %32 = vector.shape_cast %31 : vector<1x4x8x8xf32> to vector<4x8x8xf32>
    %33 = vector.shape_cast %24 : vector<8x32xf32> to vector<1x8x4x8xf32>
    %34 = tpu.transpose %33, [0, 2, 1, 3] : vector<1x8x4x8xf32> -> vector<1x4x8x8xf32>
    %35 = vector.shape_cast %34 : vector<1x4x8x8xf32> to vector<4x8x8xf32>
    %36 = vector.shape_cast %29 : vector<8x32xf32> to vector<1x8x4x8xf32>
    %37 = tpu.transpose %36, [0, 2, 1, 3] : vector<1x8x4x8xf32> -> vector<1x4x8x8xf32>
    %38 = vector.shape_cast %37 : vector<1x4x8x8xf32> to vector<4x8x8xf32>
    "tpu.trace_start"() <{level = 10 : i32, message = "zak,zok->zao"}> : () -> ()
    %cst_30 = arith.constant dense<0.000000e+00> : vector<4x8x8xf32>
    %39 = tpu.matmul %32, %35, %cst_30 {dimension_numbers = #tpu.dot_dimension_numbers<[2], [2], [1], [1], [0, 0, 0, 1, 1, 1], [0], [0]>} : vector<4x8x8xf32>, vector<4x8x8xf32>, vector<4x8x8xf32> -> vector<4x8x8xf32>
    "tpu.trace_stop"() : () -> ()
    %cst_31 = arith.constant 0.353553385 : f32
    %40 = vector.broadcast %cst_31 : f32 to vector<4x8x8xf32>
    %41 = arith.mulf %39, %40 : vector<4x8x8xf32>
    %42 = vector.shape_cast %41 : vector<4x8x8xf32> to vector<1x4x8x8xf32>
    %cst_32 = arith.constant -1.000000e+30 : f32
    %43 = vector.shape_cast %9 : vector<1x1x8x8xi1> to vector<1x1x8x8xi1>
    %44 = vector.broadcast %43 : vector<1x1x8x8xi1> to vector<1x4x8x8xi1>
    %45 = vector.broadcast %cst_32 : f32 to vector<1x4x8x8xf32>
    %46 = arith.select %44, %42, %45 : vector<1x4x8x8xi1>, vector<1x4x8x8xf32>
    %cst_33 = arith.constant dense<0xFF800000> : vector<1x4x8xf32>
    %47 = vector.multi_reduction <maximumf>, %46, %cst_33 [3] : vector<1x4x8x8xf32> to vector<1x4x8xf32>
    %48 = vector.shape_cast %47 : vector<1x4x8xf32> to vector<1x4x8x1xf32>
    %49 = vector.broadcast %48 : vector<1x4x8x1xf32> to vector<1x4x8x8xf32>
    %50 = arith.subf %46, %49 : vector<1x4x8x8xf32>
    %51 = math.exp %50 : vector<1x4x8x8xf32>
    %cst_34 = arith.constant 0.000000e+00 : f32
    %52 = vector.shape_cast %9 : vector<1x1x8x8xi1> to vector<1x1x8x8xi1>
    %53 = vector.broadcast %52 : vector<1x1x8x8xi1> to vector<1x4x8x8xi1>
    %54 = vector.broadcast %cst_34 : f32 to vector<1x4x8x8xf32>
    %55 = arith.select %53, %51, %54 : vector<1x4x8x8xi1>, vector<1x4x8x8xf32>
    %cst_35 = arith.constant dense<0.000000e+00> : vector<1x4x8xf32>
    %56 = vector.multi_reduction <add>, %55, %cst_35 [3] : vector<1x4x8x8xf32> to vector<1x4x8xf32>
    %57 = vector.shape_cast %56 : vector<1x4x8xf32> to vector<1x4x8x1xf32>
    %cst_36 = arith.constant 0.000000e+00 : f32
    %58 = vector.broadcast %cst_36 : f32 to vector<1x4x8x1xf32>
    %59 = arith.cmpf ogt, %57, %58 : vector<1x4x8x1xf32>
    %cst_37 = arith.constant 1.000000e+00 : f32
    %60 = vector.broadcast %cst_37 : f32 to vector<1x4x8x1xf32>
    %61 = arith.select %59, %57, %60 : vector<1x4x8x1xi1>, vector<1x4x8x1xf32>
    %cst_38 = arith.constant 1.000000e+00 : f32
    %62 = vector.broadcast %cst_38 : f32 to vector<1x4x8x1xf32>
    %63 = arith.divf %62, %61 : vector<1x4x8x1xf32>
    %64 = vector.broadcast %63 : vector<1x4x8x1xf32> to vector<1x4x8x8xf32>
    %65 = arith.mulf %55, %64 : vector<1x4x8x8xf32>
    %66 = tpu.transpose %65, [0, 2, 1, 3] : vector<1x4x8x8xf32> -> vector<1x8x4x8xf32>
    %67 = vector.shape_cast %66 : vector<1x8x4x8xf32> to vector<1x8x32xf32>
    %c0_39 = arith.constant 0 : index
    %c0_40 = arith.constant 0 : index
    %c0_41 = arith.constant 0 : index
    %68 = vector.load %arg18[%c0_39, %c0_40, %c0_41] : memref<1x8x32xf32, #tpu.memory_space<vmem>>, vector<1x8x32xf32>
    tpu.vector_store %arg18[%c0_39, %c0_40, %c0_41], %67 {strides = array<i32>} : memref<1x8x32xf32, #tpu.memory_space<vmem>>, vector<1x8x32xf32>,
    %69 = vector.shape_cast %65 : vector<1x4x8x8xf32> to vector<4x8x8xf32>
    "tpu.trace_start"() <{level = 10 : i32, message = "zao,zov->zav"}> : () -> ()
    %cst_42 = arith.constant dense<0.000000e+00> : vector<4x8x8xf32>
    %70 = tpu.matmul %69, %38, %cst_42 {dimension_numbers = #tpu.dot_dimension_numbers<[2], [1], [1], [2], [0, 0, 0, 1, 1, 2], [0], [0]>} : vector<4x8x8xf32>, vector<4x8x8xf32>, vector<4x8x8xf32> -> vector<4x8x8xf32>
    "tpu.trace_stop"() : () -> ()
    %71 = vector.shape_cast %70 : vector<4x8x8xf32> to vector<1x4x8x8xf32>
    %72 = tpu.transpose %71, [0, 2, 1, 3] : vector<1x4x8x8xf32> -> vector<1x8x4x8xf32>
    %73 = vector.shape_cast %72 : vector<1x8x4x8xf32> to vector<8x32xf32>
    %74 = arith.mulf %73, %19 : vector<8x32xf32>
    %c0_43 = arith.constant 0 : index
    %c0_44 = arith.constant 0 : index
    %75 = vector.load %arg13[%c0_43, %c0_44] : memref<32x32xf32, #tpu.memory_space<vmem>>, vector<32x32xf32>
    %cst_45 = arith.constant dense<0.000000e+00> : vector<8x32xf32>
    %76 = tpu.matmul %74, %75, %cst_45 {dimension_numbers = #tpu.dot_dimension_numbers<[1], [0], [0], [1], [0, 0, 1, 1], [], []>} : vector<8x32xf32>, vector<32x32xf32>, vector<8x32xf32> -> vector<8x32xf32>
    %c0_46 = arith.constant 0 : index
    %c0_47 = arith.constant 0 : index
    %77 = vector.load %arg14[%c0_46, %c0_47] : memref<1x32xf32, #tpu.memory_space<vmem>>, vector<1x32xf32>
    %78 = vector.broadcast %77 : vector<1x32xf32> to vector<8x32xf32>
    %79 = arith.addf %76, %78 : vector<8x32xf32>
    %80 = arith.addf %79, %1 : vector<8x32xf32>
    %cst_48 = arith.constant dense<0.000000e+00> : vector<8xf32>
    %81 = vector.multi_reduction <add>, %80, %cst_48 [1] : vector<8x32xf32> to vector<8xf32>
    %82 = vector.shape_cast %81 : vector<8xf32> to vector<8x1xf32>
    %cst_49 = arith.constant 3.200000e+01 : f32
    %83 = vector.broadcast %cst_49 : f32 to vector<8x1xf32>
    %84 = arith.divf %82, %83 : vector<8x1xf32>
    %85 = vector.broadcast %84 : vector<8x1xf32> to vector<8x32xf32>
    %86 = arith.subf %80, %85 : vector<8x32xf32>
    %87 = arith.mulf %86, %86 : vector<8x32xf32>
    %cst_50 = arith.constant dense<0.000000e+00> : vector<8xf32>
    %88 = vector.multi_reduction <add>, %87, %cst_50 [1] : vector<8x32xf32> to vector<8xf32>
    %89 = vector.shape_cast %88 : vector<8xf32> to vector<8x1xf32>
    %cst_51 = arith.constant 3.200000e+01 : f32
    %90 = vector.broadcast %cst_51 : f32 to vector<8x1xf32>
    %91 = arith.divf %89, %90 : vector<8x1xf32>
    %92 = vector.broadcast %84 : vector<8x1xf32> to vector<8x32xf32>
    %93 = arith.subf %80, %92 : vector<8x32xf32>
    %cst_52 = arith.constant 9.99999974E-6 : f32
    %94 = vector.broadcast %cst_52 : f32 to vector<8x1xf32>
    %95 = arith.addf %91, %94 : vector<8x1xf32>
    %96 = math.rsqrt %95 : vector<8x1xf32>
    %97 = vector.broadcast %96 : vector<8x1xf32> to vector<8x32xf32>
    %98 = arith.mulf %93, %97 : vector<8x32xf32>
    %c0_53 = arith.constant 0 : index
    %c0_54 = arith.constant 0 : index
    %99 = vector.load %arg15[%c0_53, %c0_54] : memref<1x32xf32, #tpu.memory_space<vmem>>, vector<1x32xf32>
    %100 = vector.broadcast %99 : vector<1x32xf32> to vector<8x32xf32>
    %101 = arith.mulf %98, %100 : vector<8x32xf32>
    %c0_55 = arith.constant 0 : index
    %c0_56 = arith.constant 0 : index
    %102 = vector.load %arg16[%c0_55, %c0_56] : memref<1x32xf32, #tpu.memory_space<vmem>>, vector<1x32xf32>
    %103 = vector.broadcast %102 : vector<1x32xf32> to vector<8x32xf32>
    %104 = arith.addf %101, %103 : vector<8x32xf32>
    %105 = vector.shape_cast %104 : vector<8x32xf32> to vector<1x8x32xf32>
    %c0_57 = arith.constant 0 : index
    %c0_58 = arith.constant 0 : index
    %c0_59 = arith.constant 0 : index
    %106 = vector.load %arg17[%c0_57, %c0_58, %c0_59] : memref<1x8x32xf32, #tpu.memory_space<vmem>>, vector<1x8x32xf32>
    tpu.vector_store %arg17[%c0_57, %c0_58, %c0_59], %105 {strides = array<i32>} : memref<1x8x32xf32, #tpu.memory_space<vmem>>, vector<1x8x32xf32>,
    return
  }
  func.func @transform_0(%arg0: i32) -> (i32, i32, i32) {
    %c0_i32 = arith.constant 0 : i32
    %c0_i32_0 = arith.constant 0 : i32
    %c0_i32_1 = arith.constant 0 : i32
    return %arg0, %c0_i32, %c0_i32_0 : i32, i32, i32
  }
  func.func @transform_1(%arg0: i32) -> (i32, i32, i32) {
    %c0_i32 = arith.constant 0 : i32
    %c0_i32_0 = arith.constant 0 : i32
    %c0_i32_1 = arith.constant 0 : i32
    return %arg0, %c0_i32, %c0_i32_0 : i32, i32, i32
  }
  func.func @transform_2(%arg0: i32) -> (i32, i32, i32) {
    %c0_i32 = arith.constant 0 : i32
    %c0_i32_0 = arith.constant 0 : i32
    %c0_i32_1 = arith.constant 0 : i32
    return %arg0, %c0_i32, %c0_i32_0 : i32, i32, i32
  }
  func.func @transform_3(%arg0: i32) -> (i32, i32, i32) {
    %c0_i32 = arith.constant 0 : i32
    %c0_i32_0 = arith.constant 0 : i32
    %c0_i32_1 = arith.constant 0 : i32
    return %arg0, %c0_i32, %c0_i32_0 : i32, i32, i32
  }
  func.func @transform_4(%arg0: i32) -> (i32, i32) {
    %c0_i32 = arith.constant 0 : i32
    %c0_i32_0 = arith.constant 0 : i32
    %c0_i32_1 = arith.constant 0 : i32
    return %c0_i32, %c0_i32_0 : i32, i32
  }
  func.func @transform_5(%arg0: i32) -> (i32, i32) {
    %c0_i32 = arith.constant 0 : i32
    %c0_i32_0 = arith.constant 0 : i32
    %c0_i32_1 = arith.constant 0 : i32
    return %c0_i32, %c0_i32_0 : i32, i32
  }
  func.func @transform_6(%arg0: i32) -> (i32, i32) {
    %c0_i32 = arith.constant 0 : i32
    %c0_i32_0 = arith.constant 0 : i32
    %c0_i32_1 = arith.constant 0 : i32
    return %c0_i32, %c0_i32_0 : i32, i32
  }
  func.func @transform_7(%arg0: i32) -> (i32, i32) {
    %c0_i32 = arith.constant 0 : i32
    %c0_i32_0 = arith.constant 0 : i32
    %c0_i32_1 = arith.constant 0 : i32
    return %c0_i32, %c0_i32_0 : i32, i32
  }
  func.func @transform_8(%arg0: i32) -> (i32, i32) {
    %c0_i32 = arith.constant 0 : i32
    %c0_i32_0 = arith.constant 0 : i32
    %c0_i32_1 = arith.constant 0 : i32
    return %c0_i32, %c0_i32_0 : i32, i32
  }
  func.func @transform_9(%arg0: i32) -> (i32, i32) {
    %c0_i32 = arith.constant 0 : i32
    %c0_i32_0 = arith.constant 0 : i32
    %c0_i32_1 = arith.constant 0 : i32
    return %c0_i32, %c0_i32_0 : i32, i32
  }
  func.func @transform_10(%arg0: i32) -> (i32, i32) {
    %c0_i32 = arith.constant 0 : i32
    %c0_i32_0 = arith.constant 0 : i32
    %c0_i32_1 = arith.constant 0 : i32
    return %c0_i32, %c0_i32_0 : i32, i32
  }
  func.func @transform_11(%arg0: i32) -> (i32, i32) {
    %c0_i32 = arith.constant 0 : i32
    %c0_i32_0 = arith.constant 0 : i32
    %c0_i32_1 = arith.constant 0 : i32
    return %c0_i32, %c0_i32_0 : i32, i32
  }
  func.func @transform_12(%arg0: i32) -> (i32, i32) {
    %c0_i32 = arith.constant 0 : i32
    %c0_i32_0 = arith.constant 0 : i32
    %c0_i32_1 = arith.constant 0 : i32
    return %c0_i32, %c0_i32_0 : i32, i32
  }
  func.func @transform_13(%arg0: i32) -> (i32, i32) {
    %c0_i32 = arith.constant 0 : i32
    %c0_i32_0 = arith.constant 0 : i32
    %c0_i32_1 = arith.constant 0 : i32
    return %c0_i32, %c0_i32_0 : i32, i32
  }
  func.func @transform_14(%arg0: i32) -> (i32, i32) {
    %c0_i32 = arith.constant 0 : i32
    %c0_i32_0 = arith.constant 0 : i32
    %c0_i32_1 = arith.constant 0 : i32
    return %c0_i32, %c0_i32_0 : i32, i32
  }
  func.func @transform_15(%arg0: i32) -> (i32, i32) {
    %c0_i32 = arith.constant 0 : i32
    %c0_i32_0 = arith.constant 0 : i32
    %c0_i32_1 = arith.constant 0 : i32
    return %c0_i32, %c0_i32_0 : i32, i32
  }
  func.func @transform_16(%arg0: i32) -> (i32, i32, i32) {
    %c0_i32 = arith.constant 0 : i32
    %c0_i32_0 = arith.constant 0 : i32
    %c0_i32_1 = arith.constant 0 : i32
    return %arg0, %c0_i32, %c0_i32_0 : i32, i32, i32
  }
  func.func @transform_17(%arg0: i32) -> (i32, i32, i32) {
    %c0_i32 = arith.constant 0 : i32
    %c0_i32_0 = arith.constant 0 : i32
    %c0_i32_1 = arith.constant 0 : i32
    return %arg0, %c0_i32, %c0_i32_0 : i32, i32, i32
  }
}

</mosaic_0001>

<bundles_post_ra>
// kernel: tpu_custom_call.1
= control target key start
LH: loop header
LB: loop body
LE: loop exit
PB: predicated region body
PF: predicated region fallthrough
CT: control target
= control target key end

     0   :  { %s4238_s0 = inlined_call_operand.hbm [shape: f32[2,8,32], index: 0, kind: input, shape index: {}]   ;;  %s4239_s1 = inlined_call_operand.hbm [shape: f32[2,8,32], index: 1, kind: input, shape index: {}]   ;;  %s4240_s2 = inlined_call_operand.hbm [shape: f32[2,8,32], index: 2, kind: input, shape index: {}]   ;;  %s4241_s3 = inlined_call_operand.vmem [shape: s8[2,8,8], index: 3, kind: input, shape index: {}]   ;;  %s4242_s4 = inlined_call_operand.hbm [shape: f32[32,32], index: 4, kind: input, shape index: {}]   ;;  %s4243_s5 = inlined_call_operand.vmem [shape: f32[1,32], index: 5, kind: input, shape index: {}]   ;;  %s4244_s6 = inlined_call_operand.hbm [shape: f32[32,32], index: 6, kind: input, shape index: {}]   ;;  %s4245_s7 = inlined_call_operand.vmem [shape: f32[1,32], index: 7, kind: input, shape index: {}]   ;;  %s4246_s8 = inlined_call_operand.hbm [shape: f32[32,32], index: 8, kind: input, shape index: {}]   ;;  %s4247_s9 = inlined_call_operand.vmem [shape: f32[1,32], index: 9, kind: input, shape index: {}]   ;;  %s4248_s10 = inlined_call_operand.hbm [shape: f32[32,32], index: 10, kind: input, shape index: {}]   ;;  %s4249_s11 = inlined_call_operand.vmem [shape: f32[1,32], index: 11, kind: input, shape index: {}]   ;;  %s4250_s12 = inlined_call_operand.hbm [shape: f32[32,32], index: 12, kind: input, shape index: {}]   ;;  %s4251_s13 = inlined_call_operand.vmem [shape: f32[1,32], index: 13, kind: input, shape index: {}]   ;;  %s4252_s14 = inlined_call_operand.vmem [shape: f32[1,32], index: 14, kind: input, shape index: {}]   ;;  %s4253_s15 = inlined_call_operand.vmem [shape: f32[1,32], index: 15, kind: input, shape index: {}]   ;;  %s4254_s16 = inlined_call_operand.hbm [shape: f32[2,8,32], index: 16, kind: output, shape index: {0}]   ;;  %s4255_s17 = inlined_call_operand.hbm [shape: f32[2,8,32], index: 17, kind: output, shape index: {1}]  }
   0x1   :  { %4282 = sst [smem:[#allocation32_spill]] %s4238_s0 }
   0x2   :  { %4283 = sst [smem:[#allocation33_spill]] %s4239_s1 }
   0x3   :  { %4284 = sst [smem:[#allocation34_spill]] %s4242_s4 }
   0x4   :  { %4285 = sst [smem:[#allocation35_spill]] %s4244_s6 }
   0x5   :  { %4286 = sst [smem:[#allocation36_spill]] %s4246_s8 }
   0x6   :  { %4287 = sst [smem:[#allocation37_spill]] %s4247_s9 }
   0x7   :  { %4288 = sst [smem:[#allocation38_spill]] %s4248_s10 }
   0x8   :  { %4289 = sst [smem:[#allocation39_spill]] %s4249_s11 }
   0x9   :  { %4290 = sst [smem:[#allocation40_spill]] %s4251_s13 }
   0xa   :  { %4291 = sst [smem:[#allocation41_spill]] %s4252_s14 }
   0xb   :  { %4292 = sst [smem:[#allocation42_spill]] %s4253_s15 }
   0xc   :  { %4293 = sst [smem:[#allocation43_spill]] %s4254_s16 }
   0xd   :  { %4294 = sst [smem:[#allocation44_spill]] %s4255_s17 }
   0xe   :  { %23 = vsyncpa [#allocation3], 0 }
   0xf   :  { %25 = vsyncpa [#allocation3 + $0x1], 0 }
  0x10   :  { %26 = vsyncpa [#allocation6], 0 }
  0x11   :  { %28 = vsyncpa [#allocation6 + $0x1], 0 }
  0x12   :  { %29 = vsyncpa [#allocation9], 0 }
  0x13   :  { %30 = vsyncpa [#allocation12], 0 }
  0x14   :  { %31 = vsyncpa [#allocation15], 0 }
  0x15   :  { %32 = vsyncpa [#allocation4], 0 }
  0x16   :  { %34 = vsyncpa [#allocation4 + $0x1], 0 }
  0x17   :  { %35 = vsyncpa [#allocation18], 0 }
  0x18   :  { %37 = vsyncpa [#allocation18 + $0x1], 0  ;;  %s3628_s24 = smov 0   ;;  %s3630_s25 = smov 0  }
  0x19   :  { %s3632_s26 = smov 0   ;;  %s3634_s27 = smov 0  }
  0x1a LB: > { %4295 = sst [smem:[#allocation26_spill]] %s3501_s24  ;;  %s3515_s28 = smov [#allocation8]   ;;  %s3513_s27 = sphi %s3634_s27, %s4346_s27   ;;  %s3509_s26 = sphi %s3632_s26, %s4350_s26   ;;  %s3505_s25 = sphi %s3630_s25, %s4349_s25   ;;  %s3501_s24 = sphi %s3628_s24, %s4348_s24  }
  0x1b   : > { %4296 = sst [smem:[#allocation27_spill]] %s3513_s27  ;;  %s468_s29 = sshll.u32 %s3515_s28, 4  ;;  %s469_s29 = int_to_ptr.vmem [resolvable:$true] %s468_s29 }
  0x1c   : > { %s3649_s0 = sadd.s32 4294967295, %s3513_s27   ;;  %p2845_p0 = scmp.ge.s32.totalorder %s3513_s27, 1 }
  0x1d   : > { %p4273_p1 = scmp.eq.s32.totalorder %s3649_s0, 0  ;;  %p456_p2 = scmp.lt.s32.totalorder %s3513_s27, 3 }
  0x1e   : > { %s3516_s18 = smov [#allocation11]   ;;  %s3200_s21 = scalar_lea.vmem %s469_s29, 512 }
  0x1f   : > { %p3654_p3 = pnand %p2845_p0, %p456_p2  ;;  %s500_s19 = sshll.u32 %s3516_s18, 4  ;;  %s501_s19 = int_to_ptr.vmem [resolvable:$true] %s500_s19 }
  0x20   : > { %p3201_p8 = scmp.ne.s32.totalorder %s469_s29, %s3200_s21  ;;  %p3208_p11 = scmp.lt.s32.totalorder %s469_s29, %s469_s29 }
  0x21   : > { %s4297_s30 = scalar_select %p3654_p3, 1, 0 }
  0x22   : > { %p3076_p5 = pneg %p3654_p3  ;;  %p3209_p12 = scmp.lt.s32.totalorder %s3200_s21, %s3200_s21 }
  0x24   : > { %p3663_p6 = pnand %p3076_p5, %p4273_p1  ;;  %p3210_p13 = por %p3209_p12, %p3208_p11 }
  0x26   : > { %s4298_s1 = scalar_select %p3663_p6, 1, 0 }
  0x27   : > { %p3669_p7 = pneg %p3663_p6 }
  0x29   : > { %s4299_s20 = scalar_select %p3669_p7, 1, 0 }
  0x2a   : > { %p3203_p9 = pnand %p3201_p8, %p3669_p7 }
  0x2c   : > { %p3204_p10 = pneg %p3203_p9 }
  0x2e   : > { %p3211_p0 = pnand %p3210_p13, %p3204_p10 }
  0x30   : > { %3214 = shalt.err (!%p3211_p0)
}
  0x31   : > { %s4259_s22 = smov 128   ;;  %s4262_s23 = smov 8  }
  0x32   : > { %s4300_s4 = sld [smem:[#allocation34_spill]]  ;;  %s3226_s16 = scalar_lea.vmem %s501_s19, 512 }
  0x33   : > { %p3227_p2 = scmp.ne.s32.totalorder %s501_s19, %s3226_s16  ;;  %p3234_p9 = scmp.lt.s32.totalorder %s501_s19, %s501_s19 }
  0x34   : > { %p3235_p10 = scmp.lt.s32.totalorder %s3226_s16, %s3226_s16 }
  0x35   : > { %p3229_p5 = pnand %p3227_p2, %p3669_p7 }
  0x36   : > { %p3236_p11 = por %p3235_p10, %p3234_p9 }
  0x37   : > { %p3230_p8 = pneg %p3229_p5 }
  0x38   : > { %3079 = dma.hbm_to_vmem [thread:$0]  (!%p3663_p6), %s4300_s4, 512, %s469_s29, [#allocation9], %s4259_s22, %s4259_s22, %s4262_s23  }
  0x39   : > { %p3237_p12 = pnand %p3236_p11, %p3230_p8 }
  0x3b   : > { %3240 = shalt.err (!%p3237_p12)
}
  0x3c   : > { %s4301_s8 = sld [smem:[#allocation36_spill]]  ;;  %s2844_s16 = sadd.s32 4294967294, %s3513_s27  }
  0x3d   : > { %s3695_s29 = sadd.s32 1, %s3513_s27   ;;  %s50_s28 = sadd.s32 1, %s3509_s26 }
  0x3e   : > { %4302 = sst [smem:[#allocation28_spill]] %s3695_s29  ;;  %s47_s15 = ssub.s32 %s3513_s27, %s3695_s29 }
  0x3f   : > { %p48_p13 = scmp.eq.s32.totalorder %s47_s15, 0  ;;  %p57_p0 = scmp.ne.s32.totalorder %s3509_s26, %s3505_s25 }
  0x40   : > { %p58_p2 = scmp.eq.s32.totalorder %s3513_s27, 0  ;;  %p63_p5 = scmp.ne.s32.totalorder %s3505_s25, %s3501_s24 }
  0x41   : > { %s3706_s18 = scalar_select %p48_p13, %s3509_s26, %s50_s28  }
  0x42   : > { %3085 = dma.hbm_to_vmem [thread:$0]  (!%p3663_p6), %s4301_s8, 512, %s501_s19, [#allocation12], %s4259_s22, %s4259_s22, %s4262_s23  }
  0x43   : > { %4303 = sst [smem:[#allocation29_spill]] %s3706_s18  ;;  %p59_p8 = por %p58_p2, %p57_p0 }
  0x44   : > { %p3710_p9 = por %p4273_p1, %p63_p5  ;;  %p417_p10 = scmp.eq.s32.totalorder %s3649_s0, 1 }
  0x45   : > { %p423_p11 = scmp.eq.s32.totalorder %s2844_s16, 1  ;;  %p3114_p12 = scmp.lt.s32.totalorder %s3513_s27, 2 }
  0x46   : > { %s4304_s21 = scalar_select %p3710_p9, 1, 0 }
  0x47   : > { %s4267_s19 = sand.u32 1, %s3509_s26   ;;  %p3717_p4 = por %p417_p10, %p57_p0 }
  0x48   : > { %p3721_p3 = por %p423_p11, %p63_p5  ;;  %s3727_s28 = sshll.u32 %s4267_s19, 3 }
  0x49   : > { %s4305_s22 = scalar_select %p3717_p4, 1, 0 }
  0x4a   : > { %s4307_s15 = scalar_select %p3721_p3, 1, 0 }
  0x4b   : > { %4306 = sst [smem:[#allocation30_spill]] %s4305_s22  ;;  %s3730_s23 = sshll.u32 %s3513_s27, 7 }
  0x4c   : > { %4308 = sst [smem:[#allocation31_spill]] %s4307_s15  ;;  %p3732_p13 = pnand %p3114_p12, %p59_p8 }
  0x4d   : > { %s573_s16 = sand.u32 1, %s3513_s27   ;;  %s4310_s29 = sld [smem:[#allocation33_spill]] }
  0x4e   : > { %s577_s19 = scalar_lea.vmem [#allocation5], %s3727_s28  ;;  %s3519_s14 = smov [#allocation10]  }
  0x4f   : > { %s584_s15 = sshll.u32 %s577_s19, 4  ;;  %s484_s17 = sshll.u32 %s3519_s14, 4  ;;  %s3744_s15 = int_to_ptr.vmem [resolvable:$true] %s584_s15  ;;  %s485_s17 = int_to_ptr.vmem [resolvable:$true] %s484_s17 }
  0x50   : > { %s3746_s22 = scalar_lea.sflag [#allocation6], %s573_s16  ;;  %p3752_p2 = pneg %p3732_p13 }
  0x52   : > { %s4311_s27 = scalar_select %p3752_p2, 1, 0 }
  0x53   : > { %s3741_s24 = scalar_lea.hbm %s4310_s29, %s3730_s23  ;;  %s3246_s19 = scalar_lea.hbm %s4310_s29, 256 }
  0x54   : > { %s3241_s13 = scalar_lea.hbm %s3741_s24, 128  ;;  %p3247_p10 = scmp.lt.s32.totalorder %s3741_s24, %s4310_s29 }
  0x55   : > { %p3242_p0 = scmp.ne.s32.totalorder %s3741_s24, %s3241_s13  ;;  %p3248_p11 = scmp.lt.s32.totalorder %s3246_s19, %s3241_s13 }
  0x57   : > { %p3244_p5 = pnand %p3752_p2, %p3242_p0  ;;  %p3249_p12 = por %p3248_p11, %p3247_p10 }
  0x59   : > { %p3245_p8 = pneg %p3244_p5 }
  0x5b   : > { %p3250_p1 = pnand %p3249_p12, %p3245_p8 }
  0x5d   : > { %3253 = shalt.err (!%p3250_p1)
}
  0x5e   : > { %s3254_s14 = scalar_lea.vmem %s3744_s15, 128  ;;  %s3520_s16 = smov [#allocation5]  }
  0x5f   : > { %p3255_p3 = scmp.ne.s32.totalorder %s3744_s15, %s3254_s14  ;;  %s3259_s8 = sshll.u32 %s3520_s16, 4  ;;  %s3260_s8 = int_to_ptr.vmem [resolvable:$false] %s3259_s8 }
  0x60   : > { %s3261_s18 = scalar_lea.vmem %s3260_s8, 256  ;;  %p3262_p4 = scmp.lt.s32.totalorder %s3744_s15, %s3260_s8 }
  0x61   : > { %p3257_p0 = pnand %p3255_p3, %p3752_p2  ;;  %p3263_p9 = scmp.lt.s32.totalorder %s3261_s18, %s3254_s14 }
  0x63   : > { %p3258_p5 = pneg %p3257_p0  ;;  %p3264_p6 = por %p3263_p9, %p3262_p4 }
  0x65   : > { %p3265_p7 = pnand %p3264_p6, %p3258_p5 }
  0x67   : > { %3268 = shalt.err (!%p3265_p7)
}
  0x68   : > { %3098 = dma.hbm_to_vmem [thread:$0]  (!%p3732_p13), %s3741_s24, 128, %s3744_s15, %s3746_s22  }
  0x69   : > { %s3280_s9 = scalar_lea.vmem %s485_s17, 512  ;;  %p4312_p3 = scmp.ne.s32.totalorder %s4299_s20, 0 }
  0x6a   : > { %p3281_p1 = scmp.ne.s32.totalorder %s485_s17, %s3280_s9  ;;  %p3288_p11 = scmp.lt.s32.totalorder %s485_s17, %s485_s17 }
  0x6b   : > { %p3289_p12 = scmp.lt.s32.totalorder %s3280_s9, %s3280_s9 }
  0x6c   : > { %p3283_p8 = pnand %p3281_p1, %p4312_p3 }
  0x6d   : > { %p3290_p0 = por %p3289_p12, %p3288_p11 }
  0x6e   : > { %p3284_p10 = pneg %p3283_p8 }
  0x70   : > { %p3291_p2 = pnand %p3290_p0, %p3284_p10 }
  0x72   : > { %3294 = shalt.err (!%p3291_p2)
}
  0x73   : > { %p4313_p4 = scmp.ne.s32.totalorder %s4298_s1, 0  ;;  %s4314_s11 = smov 8  }
  0x74   : > { %s4315_s13 = smov 128   ;;  %s4316_s6 = sld [smem:[#allocation35_spill]] }
  0x75   : > { %s3521_s24 = smov [#allocation13]   ;;  %s3522_s16 = smov [#allocation14]  }
  0x76   : > { %s516_s15 = sshll.u32 %s3521_s24, 4  ;;  %s532_s8 = sshll.u32 %s3522_s16, 4  ;;  %s517_s15 = int_to_ptr.vmem [resolvable:$true] %s516_s15  ;;  %s533_s8 = int_to_ptr.vmem [resolvable:$true] %s532_s8 }
  0x77   : > { %s3306_s18 = scalar_lea.vmem %s517_s15, 512  ;;  %p3314_p2 = scmp.lt.s32.totalorder %s517_s15, %s517_s15 }
  0x78   : > { %p3307_p6 = scmp.ne.s32.totalorder %s517_s15, %s3306_s18  ;;  %p3315_p5 = scmp.lt.s32.totalorder %s3306_s18, %s3306_s18 }
  0x7a   : > { %3082 = dma.hbm_to_vmem [thread:$0]  (!%p4313_p4), %s4316_s6, 512, %s485_s17, [#allocation9], %s4315_s13, %s4315_s13, %s4314_s11  }
  0x7b   : > { %p3309_p7 = pnand %p3307_p6, %p4312_p3  ;;  %p3316_p1 = por %p3315_p5, %p3314_p2 }
  0x7d   : > { %p3310_p9 = pneg %p3309_p7 }
  0x7f   : > { %p3317_p8 = pnand %p3316_p1, %p3310_p9 }
  0x81   : > { %3320 = shalt.err (!%p3317_p8)
}
  0x82   : > { %s4317_s10 = sld [smem:[#allocation38_spill]]  ;;  %s3332_s19 = scalar_lea.vmem %s533_s8, 512 }
  0x83   : > { %p3333_p10 = scmp.ne.s32.totalorder %s533_s8, %s3332_s19  ;;  %p3340_p0 = scmp.lt.s32.totalorder %s533_s8, %s533_s8 }
  0x84   : > { %p3341_p6 = scmp.lt.s32.totalorder %s3332_s19, %s3332_s19 }
  0x85   : > { %p3335_p11 = pnand %p3333_p10, %p4312_p3 }
  0x86   : > { %p3342_p7 = por %p3341_p6, %p3340_p0 }
  0x87   : > { %p3336_p12 = pneg %p3335_p11 }
  0x88   : > { %3088 = dma.hbm_to_vmem [thread:$0]  (!%p4313_p4), %s4317_s10, 512, %s517_s15, [#allocation12], %s4315_s13, %s4315_s13, %s4314_s11  }
  0x89   : > { %p3343_p9 = pnand %p3342_p7, %p3336_p12 }
  0x8b   : > { %3346 = shalt.err (!%p3343_p9)
}
  0x8c   : > { %3091 = dma.hbm_to_vmem [thread:$0]  (!%p4313_p4), %s4250_s12, 512, %s533_s8, [#allocation15], %s4315_s13, %s4315_s13, %s4314_s11  }
  0x8d   : > { %s4318_s16 = sld [smem:[#allocation32_spill]]  ;;  %s559_s1 = scalar_lea.vmem [#allocation2], %s3727_s28 }
  0x8e   : > { %s566_s17 = sshll.u32 %s559_s1, 4  ;;  %s3816_s14 = scalar_lea.hbm %s4240_s2, %s3730_s23  ;;  %s567_s17 = int_to_ptr.vmem [resolvable:$true] %s566_s17 }
  0x8f   : > { %s4319_s24 = sand.u32 1, %s3509_s26   ;;  %p4320_p4 = scmp.ne.s32.totalorder %s4311_s27, 0 }
  0x90   : > { %s556_s6 = scalar_lea.sflag [#allocation3], %s4319_s24 }
  0x93   : > { %s3809_s18 = scalar_lea.hbm %s4318_s16, %s3730_s23  ;;  %s3352_s8 = scalar_lea.hbm %s4318_s16, 256 }
  0x94   : > { %s3347_s10 = scalar_lea.hbm %s3809_s18, 128  ;;  %p3353_p1 = scmp.lt.s32.totalorder %s3809_s18, %s4318_s16 }
  0x95   : > { %p3348_p3 = scmp.ne.s32.totalorder %s3809_s18, %s3347_s10  ;;  %p3354_p8 = scmp.lt.s32.totalorder %s3352_s8, %s3347_s10 }
  0x97   : > { %p3350_p2 = pnand %p3348_p3, %p4320_p4  ;;  %p3355_p10 = por %p3354_p8, %p3353_p1 }
  0x99   : > { %p3351_p5 = pneg %p3350_p2 }
  0x9b   : > { %p3356_p11 = pnand %p3355_p10, %p3351_p5 }
  0x9d   : > { %3359 = shalt.err (!%p3356_p11)
}
  0x9e   : > { %s3360_s23 = scalar_lea.vmem %s567_s17, 128  ;;  %s3523_s1 = smov [#allocation2]  }
  0x9f   : > { %p3361_p12 = scmp.ne.s32.totalorder %s567_s17, %s3360_s23  ;;  %s3365_s9 = sshll.u32 %s3523_s1, 4  ;;  %s3366_s9 = int_to_ptr.vmem [resolvable:$false] %s3365_s9 }
  0xa0   : > { %s3367_s19 = scalar_lea.vmem %s3366_s9, 256  ;;  %p3368_p7 = scmp.lt.s32.totalorder %s567_s17, %s3366_s9 }
  0xa1   : > { %p3363_p0 = pnand %p3361_p12, %p4320_p4  ;;  %p3369_p9 = scmp.lt.s32.totalorder %s3367_s19, %s3360_s23 }
  0xa3   : > { %p3364_p6 = pneg %p3363_p0  ;;  %p3370_p3 = por %p3369_p9, %p3368_p7 }
  0xa5   : > { %p3371_p2 = pnand %p3370_p3, %p3364_p6 }
  0xa7   : > { %3374 = shalt.err (!%p3371_p2)
}
  0xa8   : > { %3095 = dma.hbm_to_vmem [thread:$0]  (!%p3732_p13), %s3809_s18, 128, %s567_s17, %s556_s6  }
  0xa9   : > { %s595_s10 = scalar_lea.vmem [#allocation7], %s3727_s28  ;;  %s3375_s11 = scalar_lea.hbm %s3816_s14, 128 }
  0xaa   : > { %s602_s24 = sshll.u32 %s595_s10, 4  ;;  %p3376_p5 = scmp.ne.s32.totalorder %s3816_s14, %s3375_s11  ;;  %s603_s24 = int_to_ptr.vmem [resolvable:$true] %s602_s24 }
  0xab   : > { %s3380_s20 = scalar_lea.hbm %s4240_s2, 256  ;;  %p3381_p10 = scmp.lt.s32.totalorder %s3816_s14, %s4240_s2 }
  0xac   : > { %p3378_p1 = pnand %p3376_p5, %p4320_p4  ;;  %p3382_p11 = scmp.lt.s32.totalorder %s3380_s20, %s3375_s11 }
  0xae   : > { %p3379_p8 = pneg %p3378_p1  ;;  %p3383_p12 = por %p3382_p11, %p3381_p10 }
  0xb0   : > { %p3384_p0 = pnand %p3383_p12, %p3379_p8 }
  0xb2   : > { %3387 = shalt.err (!%p3384_p0)
}
  0xb3   : > { %s3388_s6 = scalar_lea.vmem %s603_s24, 128  ;;  %s3524_s28 = smov [#allocation7]  }
  0xb4   : > { %p3389_p6 = scmp.ne.s32.totalorder %s603_s24, %s3388_s6  ;;  %s3393_s18 = sshll.u32 %s3524_s28, 4  ;;  %s3394_s18 = int_to_ptr.vmem [resolvable:$false] %s3393_s18 }
  0xb5   : > { %s3395_s17 = scalar_lea.vmem %s3394_s18, 256  ;;  %p3396_p3 = scmp.lt.s32.totalorder %s603_s24, %s3394_s18 }
  0xb6   : > { %p3391_p7 = pnand %p3389_p6, %p4320_p4  ;;  %p3397_p2 = scmp.lt.s32.totalorder %s3395_s17, %s3388_s6 }
  0xb8   : > { %p3392_p9 = pneg %p3391_p7  ;;  %p3398_p5 = por %p3397_p2, %p3396_p3 }
  0xba   : > { %p3399_p1 = pnand %p3398_p5, %p3392_p9 }
  0xbc   : > { %3402 = shalt.err (!%p3399_p1)
}
  0xbd   : > { %3101 = dma.hbm_to_vmem [thread:$0]  (!%p3732_p13), %s3816_s14, 128, %s603_s24, %s3746_s22  }
  0xbe   : > { %p4321_p8 = scmp.ne.s32.totalorder %s4297_s30, 0 }
  0xbf   : > { %s3857_s27 = sand.u32 (!%p4321_p8), 1, %s3505_s25   ;;  %p4322_p4 = scmp.ne.s32.totalorder (!%p4321_p8), %s4304_s21, 0 }
  0xc0   : > { %618 = sbr.rel (%p4321_p8) target bundleno = 1952 (0x7a0), region = 84  ;;  %s3860_s1 = sshll.u32 (!%p4321_p8), %s3857_s27, 3 }
  0xc1   : > { %s621_s9 = scalar_lea.sflag (!%p4321_p8), [#allocation3], %s3857_s27  ;;  %s624_s19 = scalar_lea.vmem (!%p4321_p8), [#allocation2], %s3860_s1 }
  0xc5   : > { %3472 = dma.done.wait (%p4322_p4), %s621_s9, 128  }
  0xc6   : > { %3474 = vsyncadd (%p4322_p4), %s621_s9, 4294967168  ;;  %s629_s4 = sand.u32 1, %s3649_s0   ;;  %s633_s22 = scalar_lea.vmem [#allocation5], %s3860_s1 }
  0xc7   : > { %s630_s30 = scalar_lea.sflag [#allocation6], %s629_s4 }
  0xc8   : > { %3476 = dma.done.wait (%p4322_p4), %s630_s30, 256  }
  0xc9   : > { %3478 = vsyncadd (%p4322_p4), %s630_s30, 4294967040  ;;  %s642_s14 = scalar_lea.vmem [#allocation7], %s3860_s1  ;;  %p4323_p13 = scmp.eq.s32.totalorder %s3649_s0, 0 }
  0xcb   : > { %3480 = dma.done.wait (%p4323_p13), [#allocation9], 1024   ;;  %p4324_p10 = pmov %p4323_p13 }
  0xcd   : > { %3482 = vsyncadd (%p4324_p10), [#allocation9], 4294966272  ;;  %p4325_p11 = pmov %p4324_p10 }
  0xce   : > { %p4326_p12 = pmov %p4324_p10 }
  0xcf   : > { %3484 = dma.done.wait (%p4325_p11), [#allocation12], 1024  }
  0xd0   : > { %3486 = vsyncadd (%p4326_p12), [#allocation12], 4294966272  ;;  %p4327_p0 = pmov %p4324_p10 }
  0xd2   : > { %3488 = dma.done.wait (%p4327_p0), [#allocation15], 512   ;;  %p4328_p6 = pmov %p4327_p0 }
  0xd3   : > { %v3525_v0 = vmov 0.0   ;;  %vm3526_vm0 = vmmov 0   ;;  %v746_v1 = vld [vmem:[#allocation8 + $0x18] sm:$0xff]  ;;  %v745_v2 = vld [vmem:[#allocation8 + $0x10] sm:$0xff]  ;;  %v744_v3 = vld [vmem:[#allocation8 + $0x8] sm:$0xff]  ;;  %vm754_vm1 = vcmask 261120   ;;  %v1092_v30 = vlaneseq }
  0xd4   : > { %3490 = vsyncadd (%p4328_p6), [#allocation15], 4294966784  ;;  %2951 = vmatprep.subr.mxu0 %v3525_v0  ;;  %2959 = vmatprep.mubr.msk.f32.mxu0 %vm3526_vm0, %v3525_v0  ;;  %v743_v4 = vld [vmem:[#allocation8] sm:$0xff]  ;;  %v3895_v5 = vld [vmem:[%s624_s19] sm:$0xff]  ;;  %s3527_s24 = smov 120   ;;  %s3528_s8 = smov 104  }
  0xd5   : > { %2962 = vmatprep.subr.mxu1 %v3525_v0  ;;  %2970 = vmatprep.mubr.msk.f32.mxu1 %vm3526_vm0, %v3525_v0  ;;  %v912_v6 = vld [vmem:[#allocation10 + $0x18] sm:$0xff]  ;;  %v911_v7 = vld [vmem:[#allocation10 + $0x10] sm:$0xff]  ;;  %v910_v8 = vld [vmem:[#allocation10 + $0x8] sm:$0xff]  ;;  %s3529_s20 = smov 112   ;;  %v3530_v28 = vmov 1983009808  }
  0xd6   : > { %2952 = vmatpush3.msra.mxu0 %v746_v1  ;;  %v909_v9 = vld [vmem:[#allocation10] sm:$0xff]  ;;  %v2870_v11 = vld [vmem:[%s4243_s5] ss:$0 sm:$0xff]  ;;  %v831_v15 = vld [vmem:[#allocation13 + $0x18] sm:$0xff]  ;;  %v1090_v29 = vunpack.c.l.s4 %v3530_v28  ;;  %v3531_v32 = vmov 1934713408  }
  0xd7   : > { %2953 = vmatprep.subr.mxu0 %v3525_v0  ;;  %v739_v10 = vld [vmem:[%s633_s22] sm:$0xff]  ;;  %2963 = vmatpush3.msra.mxu1 %v831_v15  ;;  %v830_v16 = vld [vmem:[#allocation13 + $0x10] sm:$0xff]  ;;  %v996_v23 = vld [vmem:[#allocation11 + $0x18] sm:$0xff]  ;;  %v1122_v33 = vunpack.c.l.s4 %v3531_v32  ;;  %v1093_v35 = vshrl.u32 %v1092_v30, 7  ;;  %vm1515_vm2 = vcmask 64512   ;;  %p732_p7 = scmp.lt.s32.totalorder %s3649_s0, 1 }
  0xd8   : > { %2954 = vmatpush3.msra.mxu0 %v745_v2  ;;  %2964 = vmatprep.subr.mxu1 %v3525_v0  ;;  %v2874_v17 = vld [vmem:[%s4245_s7] ss:$0 sm:$0xff]  ;;  %v829_v18 = vld [vmem:[#allocation13 + $0x8] sm:$0xff]  ;;  %v828_v21 = vld [vmem:[#allocation13] sm:$0xff]  ;;  %v1091_v34 = vunpack.c.0.s8 %v1090_v29  ;;  %s4331_s19 = sld [smem:[#allocation37_spill]]  ;;  %s3533_s4 = smov 16  }
  0xd9   : > { %2955 = vmatprep.subr.mxu0 %v3525_v0  ;;  %2965 = vmatpush3.msra.mxu1 %v830_v16  ;;  %v995_v24 = vld [vmem:[#allocation11 + $0x10] sm:$0xff]  ;;  %v994_v25 = vld [vmem:[#allocation11 + $0x8] sm:$0xff]  ;;  %v993_v26 = vld [vmem:[#allocation11] sm:$0xff]  ;;  %v1123_v38 = vunpack.c.0.s8 %v1122_v33  ;;  %s733_s15 = scalar_select %p732_p7, %s3649_s0, 1  ;;  %vm2042_vm9 = vcmask 130048   ;;  %vm2044_vm10 = vcmask 195584  }
  0xda   : > { %2956 = vmatpush3.msra.mxu0 %v744_v3  ;;  %2966 = vmatprep.subr.mxu1 %v3525_v0  ;;  %v740_v27 = vld [vmem:[%s642_s14] sm:$0xff]  ;;  %v3946_v39 = vsub.s32 %v1091_v34, %v1093_v35  ;;  %s3534_s30 = smov 8   ;;  %s3535_s22 = smov 24  }
  0xdb   : > { %2957 = vmatprep.subr.mxu0 %v3525_v0  ;;  %2967 = vmatpush3.msra.mxu1 %v829_v18  ;;  %v3948_v46 = vsub.s32 %v1123_v38, %v1093_v35  ;;  %s2869_s23 = sshll.u32 %s733_s15, 1  ;;  %s4332_s10 = sld [smem:[#allocation39_spill]] }
  0xdc   : > { %2958 = vmatpush3.msra.mxu0 %v743_v4  ;;  %2968 = vmatprep.subr.mxu1 %v3525_v0  ;;  %s735_s18 = scalar_lea.vmem %s4241_s3, %s2869_s23  ;;  %s4333_s13 = sld [smem:[#allocation40_spill]] }
  0xdd   : > { %2960 = vmatmul.mubr.msk.f32.vlgmr.msra.gmra.mxu0 %vm754_vm1, %v3895_v5  ;;  %2973 = vmatprep.subr.mxu0 %v3525_v0  ;;  %s731_s15 = scalar_lea.vmem [#allocation17], %s3860_s1  ;;  %s2613_s9 = scalar_lea.sflag [#allocation18], %s3857_s27 }
  0xde   : > { %2974 = vmatpush3.msra.mxu0 %v912_v6  ;;  %2981 = vmatprep.mubr.msk.f32.mxu0 %vm3526_vm0, %v3525_v0  ;;  %s2639_s23 = sshll.u32 %s731_s15, 4  ;;  %s2640_s23 = int_to_ptr.vmem [resolvable:$true] %s2639_s23 }
  0xdf   : > { %2975 = vmatprep.subr.mxu0 %v3525_v0  ;;  %2969 = vmatpush3.msra.mxu1 %v828_v21 }
  0xe0   : > { %2976 = vmatpush3.msra.mxu0 %v911_v7  ;;  %2984 = vmatprep.subr.mxu1 %v3525_v0 }
  0xe1   : > { %2977 = vmatprep.subr.mxu0 %v3525_v0  ;;  %2971 = vmatmul.mubr.msk.f32.vlgmr.msra.gmra.mxu1 %vm754_vm1, %v3895_v5 }
  0xe2   : > { %2978 = vmatpush3.msra.mxu0 %v910_v8  ;;  %2985 = vmatpush3.msra.mxu1 %v996_v23 }
  0xe3   : > { %2979 = vmatprep.subr.mxu0 %v3525_v0  ;;  %2992 = vmatprep.mubr.msk.f32.mxu1 %vm3526_vm0, %v3525_v0 }
  0xe4   : > { %2980 = vmatpush3.msra.mxu0 %v909_v9  ;;  %2986 = vmatprep.subr.mxu1 %v3525_v0 }
  0xe5   : > { %2982 = vmatmul.mubr.msk.f32.vlgmr.msra.gmra.mxu0 %vm754_vm1, %v739_v10  ;;  %3005 = vmatprep.subr.mxu0 %v3525_v0 }
  0xe6   : > { %3007 = vmatprep.mubr.msk.f32.mxu0 %vm3526_vm0, %v3525_v0  ;;  %2987 = vmatpush3.msra.mxu1 %v995_v24 }
  0xe7   : > { %2988 = vmatprep.subr.mxu1 %v3525_v0 }
  0xe8   : > { %2989 = vmatpush3.msra.mxu1 %v994_v25 }
  0xe9   : > { %2990 = vmatprep.subr.mxu1 %v3525_v0 }
  0xea   : > { %2991 = vmatpush3.msra.mxu1 %v993_v26 }
  0xeb   : > { %2993 = vmatmul.mubr.msk.f32.vlgmr.msra.gmra.mxu1 %vm754_vm1, %v740_v27  ;;  %2995 = vmatprep.subr.mxu1 %v3525_v0 }
  0xec   : > { %2997 = vmatprep.mubr.msk.f32.mxu1 %vm3526_vm0, %v3525_v0 }
 0x19d   : > { %v824_v12 = vpop.f32.mrf.mxu0 }
 0x19e   : > { %v3915_v13 = vadd.f32 %v2870_v11, %v824_v12 }
 0x19f   : > { %v2961_v14 = vpop.f32.mrf.mxu0 }
 0x1a0   : > { %1078 = vrot.lane.b32.xlu1 %v3915_v13, %s3527_s24 }
 0x1a5   : > { %v989_v19 = vpop.f32.mrf.mxu0 }
 0x1a6   : > { %v990_v20 = vadd.f32 %v2874_v17, %v989_v19 }
 0x1a7   : > { %v2983_v22 = vpop.f32.mrf.mxu0 }
 0x1a8   : > { %1230 = vrot.lane.b32.xlu1 %v990_v20, %s3528_s8  ;;  %1224 = vrot.lane.b32.xlu0 %v990_v20, %s3527_s24 }
 0x1ac   : > { %1084 = vrot.lane.b32.xlu1 %v3915_v13, %s3528_s8  ;;  %1227 = vrot.lane.b32.xlu0 %v990_v20, %s3529_s20 }
 0x1b0   : > { %1081 = vrot.lane.b32.xlu0 %v3915_v13, %s3529_s20 }
 0x212   : > { %v1079_v31 = vpop.permute.xlu1 %1078 }
 0x21a   : > { %v1231_v36 = vpop.permute.xlu1 %1230  ;;  %v1225_v37 = vpop.permute.xlu0 %1224 }
 0x21b   : > { %v1249_v40 = vcombine.low %v1225_v37, %v1231_v36  ;;  %v1250_v41 = vcombine.high %v1225_v37, %v1231_v36 }
 0x21d   : > { %v1257_v47 = vrot.slane %v1249_v40, %v3946_v39  ;;  %v1264_v48 = vrot.slane %v1250_v41, %v3946_v39 }
 0x21e   : > { %v1228_v42 = vpop.permute.xlu0 %1227  ;;  %v1085_v43 = vpop.permute.xlu1 %1084 }
 0x21f   : > { %v1233_v44 = vcombine.low %v990_v20, %v1228_v42  ;;  %v1234_v45 = vcombine.high %v990_v20, %v1228_v42  ;;  %v1103_v51 = vcombine.low %v1079_v31, %v1085_v43  ;;  %v1104_v52 = vcombine.high %v1079_v31, %v1085_v43 }
 0x221   : > { %v1241_v49 = vrot.slane %v1233_v44, %v3946_v39  ;;  %v1248_v50 = vrot.slane %v1234_v45, %v3946_v39  ;;  %v1111_v1 = vrot.slane %v1103_v51, %v3946_v39  ;;  %v1118_v2 = vrot.slane %v1104_v52, %v3946_v39 }
 0x222   : > { %v1082_v53 = vpop.permute.xlu0 %1081 }
 0x223   : > { %v1265_v54 = vcombine.low %v1241_v49, %v1257_v47  ;;  %v1266_v55 = vcombine.high %v1241_v49, %v1257_v47  ;;  %v1281_v56 = vcombine.low %v1248_v50, %v1264_v48  ;;  %v1282_v57 = vcombine.high %v1248_v50, %v1264_v48 }
 0x224   : > { %v1087_v58 = vcombine.low %v3915_v13, %v1082_v53  ;;  %v1088_v59 = vcombine.high %v3915_v13, %v1082_v53 }
 0x225   : > { %v1273_v60 = vrot.slane %v1265_v54, %v3948_v46  ;;  %v1280_v61 = vrot.slane %v1266_v55, %v3948_v46  ;;  %v1289_v62 = vrot.slane %v1281_v56, %v3948_v46  ;;  %v1296_v63 = vrot.slane %v1282_v57, %v3948_v46  ;;  %v4004_v56 = vpop.f32.mrf.mxu1 }
 0x226   : > { %v1095_v3 = vrot.slane %v1087_v58, %v3946_v39  ;;  %v1102_v4 = vrot.slane %v1088_v59, %v3946_v39 }
 0x227   : > { %v1301_v6 = vcombine.low %v1273_v60, %v1280_v61  ;;  %v2880_v7 = vcombine.high %v1273_v60, %v1280_v61  ;;  %v1317_v8 = vcombine.low %v1289_v62, %v1296_v63  ;;  %v2881_v9 = vcombine.high %v1289_v62, %v1296_v63  ;;  %v2972_v57 = vpop.f32.mrf.mxu1  ;;  %v741_v60 = vld [vmem:[%s735_s18] sm:$0x3]  ;;  %s4335_s18 = sld [smem:[#allocation44_spill]] }
 0x228   : > { %v1119_v10 = vcombine.low %v1095_v3, %v1111_v1  ;;  %v1120_v11 = vcombine.high %v1095_v3, %v1111_v1  ;;  %v1135_v12 = vcombine.low %v1102_v4, %v1118_v2  ;;  %v1136_v13 = vcombine.high %v1102_v4, %v1118_v2 }
 0x229   : > { %v1308_v14 = vrot.slane %v1301_v6, %v3946_v39  ;;  %v1316_v15 = vrot.slane %v2880_v7, %v3946_v39  ;;  %v1324_v16 = vrot.slane %v1317_v8, %v3946_v39  ;;  %v1332_v17 = vrot.slane %v2881_v9, %v3946_v39  ;;  %v1073_v58 = vpop.f32.mrf.mxu1 }
 0x22a   : > { %v1127_v18 = vrot.slane %v1119_v10, %v3948_v46  ;;  %v1134_v19 = vrot.slane %v1120_v11, %v3948_v46  ;;  %v1143_v20 = vrot.slane %v1135_v12, %v3948_v46  ;;  %v1150_v21 = vrot.slane %v1136_v13, %v3948_v46 }
 0x22b   : > { %v1333_v22 = vcombine.low %v1308_v14, %v1316_v15  ;;  %v1334_v23 = vcombine.high %v1308_v14, %v1316_v15  ;;  %v1349_v24 = vcombine.low %v1324_v16, %v1332_v17  ;;  %v1350_v25 = vcombine.high %v1324_v16, %v1332_v17  ;;  %v2994_v59 = vpop.f32.mrf.mxu1 }
 0x22c   : > { %v1155_v26 = vcombine.low %v1127_v18, %v1134_v19  ;;  %v2878_v27 = vcombine.high %v1127_v18, %v1134_v19  ;;  %v1171_v28 = vcombine.low %v1143_v20, %v1150_v21  ;;  %v2879_v29 = vcombine.high %v1143_v20, %v1150_v21 }
 0x22d   : > { %v1341_v30 = vrot.slane %v1333_v22, %v3948_v46  ;;  %v1357_v31 = vrot.slane %v1349_v24, %v3948_v46  ;;  %v1348_v32 = vrot.slane %v1334_v23, %v3948_v46  ;;  %v1364_v33 = vrot.slane %v1350_v25, %v3948_v46  ;;  %v2876_v23 = vld [vmem:[%s4331_s19] ss:$0 sm:$0xff]  ;;  %s3403_s19 = scalar_lea.vmem %s2640_s23, 128 }
 0x22e   : > { %v1162_v34 = vrot.slane %v1155_v26, %v3946_v39  ;;  %v1170_v35 = vrot.slane %v2878_v27, %v3946_v39  ;;  %v1178_v36 = vrot.slane %v1171_v28, %v3946_v39  ;;  %v1186_v37 = vrot.slane %v2879_v29, %v3946_v39  ;;  %p3404_p9 = scmp.ne.s32.totalorder %s2640_s23, %s3403_s19 }
 0x22f   : > { %v1365_v38 = vcombine.low %v1341_v30, %v1357_v31  ;;  %v1367_v40 = vcombine.low %v1348_v32, %v1364_v33  ;;  %v1366_v52 = vcombine.high %v1341_v30, %v1357_v31  ;;  %v1368_v54 = vcombine.high %v1348_v32, %v1364_v33 }
 0x230   : > { %v1187_v41 = vcombine.low %v1162_v34, %v1170_v35  ;;  %v1188_v42 = vcombine.high %v1162_v34, %v1170_v35  ;;  %v1203_v43 = vcombine.low %v1178_v36, %v1186_v37  ;;  %v1204_v44 = vcombine.high %v1178_v36, %v1186_v37 }
 0x231   : > { %2996 = vmatpush3.xpose.msk.msra.mxu1 %vm1515_vm2, %v1365_v38  ;;  %3006 = vmatpush3.xpose.msk.msra.mxu0 %vm1515_vm2, %v1367_v40  ;;  %vm742_vm3 = vnez %v741_v60  ;;  %v3532_v61 = vmov 0   ;;  %v4030_v24 = vadd.f32 %v2876_v23, %v1073_v58 }
 0x232   : > { %3000 = vmatprep.subr.mxu1 %v3525_v0  ;;  %v1195_v45 = vrot.slane %v1187_v41, %v3948_v46  ;;  %v1211_v47 = vrot.slane %v1203_v43, %v3948_v46  ;;  %v1202_v48 = vrot.slane %v1188_v42, %v3948_v46  ;;  %v1218_v49 = vrot.slane %v1204_v44, %v3948_v46 }
 0x233   : > { %3015 = vmatprep.subr.mxu0 %v3525_v0  ;;  %v1824_v62 = vsel %vm742_vm3, 16843009, %v3532_v61 }
 0x234   : > { %v1219_v50 = vcombine.low %v1195_v45, %v1211_v47  ;;  %v1221_v51 = vcombine.low %v1202_v48, %v1218_v49  ;;  %v1220_v53 = vcombine.high %v1195_v45, %v1211_v47  ;;  %v1222_v55 = vcombine.high %v1202_v48, %v1218_v49 }
 0x235   : > { %v1825_v63 = vunpack.c.0.s8 %v1824_v62 }
 0x236   : > { %2998 = vmatmul.mubr.msk.f32.vlgmr.msra.gmra.mxu1 %vm1515_vm2, %v1219_v50  ;;  %3008 = vmatmul.mubr.msk.f32.vlgmr.msra.gmra.mxu0 %vm1515_vm2, %v1221_v51 }
 0x237   : > { %3001 = vmatpush3.xpose.msk.msra.mxu1 %vm1515_vm2, %v1366_v52  ;;  %3002 = vmatprep.mubr.msk.f32.mxu1 %vm3526_vm0, %v3525_v0  ;;  %vm4011_vm4 = vcmp.ne.s32.totalorder %v1825_v63, 0 }
 0x238   : > { %3010 = vmatprep.subr.mxu1 %v3525_v0  ;;  %3017 = vmatprep.mubr.msk.f32.mxu0 %vm3526_vm0, %v3525_v0 }
 0x23a   : > { %3003 = vmatmul.mubr.msk.f32.vlgmr.msra.gmra.mxu1 %vm1515_vm2, %v1220_v53 }
 0x23b   : > { %3011 = vmatpush3.xpose.msk.msra.mxu1 %vm1515_vm2, %v1368_v54  ;;  %3012 = vmatprep.mubr.msk.f32.mxu1 %vm3526_vm0, %v3525_v0 }
 0x23c   : > { %3020 = vmatprep.subr.mxu1 %v3525_v0 }
 0x23e   : > { %3013 = vmatmul.mubr.msk.f32.vlgmr.msra.gmra.mxu1 %vm1515_vm2, %v1222_v55 }
 0x23f   : > { %3022 = vmatprep.mubr.msk.f32.mxu1 %vm3526_vm0, %v3525_v0 }
 0x2f6   : > { %v1588_v1 = vpop.f32.mrf.mxu1  ;;  %v1740_v2 = vpop.f32.mrf.mxu0 }
 0x2f7   : > { %v1820_v4 = vmul.f32 0.35355338, %v1588_v1  ;;  %v1822_v6 = vmul.f32 0.35355338, %v1740_v2 }
 0x2f8   : > { %v2999_v7 = vpop.f32.mrf.mxu1  ;;  %v3009_v8 = vpop.f32.mrf.mxu0 }
 0x2f9   : > { %v1829_v9 = vsel %vm4011_vm4, %v1820_v4, -1e+30  ;;  %v1831_v13 = vsel %vm4011_vm4, %v1822_v6, -1e+30 }
 0x2fa   : > { %v1664_v10 = vpop.f32.mrf.mxu1  ;;  %v1833_v11 = vsel %vm1515_vm2, %v1829_v9, -inf  ;;  %v1839_v18 = vsel %vm1515_vm2, %v1831_v13, -inf }
 0x2fb   : > { %v1821_v12 = vmul.f32 0.35355338, %v1664_v10  ;;  %1834 = vmax.xlane.f32.xlu0 %v1833_v11 }
 0x2fc   : > { %v3004_v14 = vpop.f32.mrf.mxu1 }
 0x2fd   : > { %v1830_v15 = vsel %vm4011_vm4, %v1821_v12, -1e+30 }
 0x2fe   : > { %v1816_v16 = vpop.f32.mrf.mxu1  ;;  %v1836_v17 = vsel %vm1515_vm2, %v1830_v15, -inf }
 0x2ff   : > { %v1823_v19 = vmul.f32 0.35355338, %v1816_v16  ;;  %1837 = vmax.xlane.f32.xlu1 %v1836_v17  ;;  %1840 = vmax.xlane.f32.xlu0 %v1839_v18 }
 0x300   : > { %v3014_v20 = vpop.f32.mrf.mxu1 }
 0x301   : > { %v1832_v21 = vsel %vm4011_vm4, %v1823_v19, -1e+30 }
 0x302   : > { %v1842_v22 = vsel %vm1515_vm2, %v1832_v21, -inf }
 0x303   : > { %1843 = vmax.xlane.f32.xlu0 %v1842_v22 }
 0x310   : > { %1370 = vrot.lane.b32.xlu1 %v4030_v24, %s3527_s24 }
 0x384   : > { %v1835_v25 = vpop.xlane.xlu0 %1834 }
 0x385   : > { %v1845_v26 = vsub.f32 %v1829_v9, %v1835_v25 }
 0x387   : > { %v1849_v27 = vmul.f32 1.442695, %v1845_v26 }
 0x388   : > { %v1838_v28 = vpop.xlane.xlu1 %1837  ;;  %v1841_v29 = vpop.xlane.xlu0 %1840 }
 0x389   : > { %3171 = vpow2.f32 %v1849_v27  ;;  %v1846_v30 = vsub.f32 %v1830_v15, %v1838_v28  ;;  %v1847_v31 = vsub.f32 %v1831_v13, %v1841_v29 }
 0x38b   : > { %v1851_v32 = vmul.f32 1.442695, %v1846_v30  ;;  %v1853_v33 = vmul.f32 1.442695, %v1847_v31 }
 0x38c   : > { %v1844_v34 = vpop.xlane.xlu0 %1843  ;;  %v1371_v51 = vpop.permute.xlu1 %1370 }
 0x38d   : > { %3173 = vpow2.f32 %v1851_v32  ;;  %v1848_v35 = vsub.f32 %v1832_v21, %v1844_v34 }
 0x38e   : > { %3175 = vpow2.f32 %v1853_v33 }
 0x38f   : > { %v1855_v36 = vmul.f32 1.442695, %v1848_v35 }
 0x391   : > { %3177 = vpow2.f32 %v1855_v36 }
 0x396   : > { %v3172_v37 = vpop.eup %3171 }
 0x397   : > { %v1857_v38 = vsel %vm4011_vm4, %v3172_v37, 0.0 }
 0x398   : > { %v1861_v40 = vsel %vm1515_vm2, %v1857_v38, 0.0 }
 0x399   : > { %1862 = vadd.xlane.f32.xlu1 %v1861_v40 }
 0x39a   : > { %v3174_v41 = vpop.eup %3173 }
 0x39b   : > { %v3176_v42 = vpop.eup %3175  ;;  %v4039_v43 = vsel %vm4011_vm4, %v3174_v41, 0.0 }
 0x39c   : > { %v1864_v44 = vsel %vm1515_vm2, %v4039_v43, 0.0  ;;  %v1859_v45 = vsel %vm4011_vm4, %v3176_v42, 0.0 }
 0x39d   : > { %1865 = vadd.xlane.f32.xlu0 %v1864_v44  ;;  %v1867_v47 = vsel %vm1515_vm2, %v1859_v45, 0.0 }
 0x39e   : > { %v3178_v48 = vpop.eup %3177  ;;  %1868 = vadd.xlane.f32.xlu1 %v1867_v47 }
 0x39f   : > { %v1860_v49 = vsel %vm4011_vm4, %v3178_v48, 0.0 }
 0x3a0   : > { %v1870_v50 = vsel %vm1515_vm2, %v1860_v49, 0.0 }
 0x3a1   : > { %1871 = vadd.xlane.f32.xlu0 %v1870_v50 }
 0x3af   : > { %1376 = vrot.lane.b32.xlu1 %v4030_v24, %s3528_s8  ;;  %s2906_s8 = sshll.u32 %s3649_s0, 7 }
 0x3b0   : > { %s4173_s17 = scalar_lea.hbm %s4335_s18, %s2906_s8 }
 0x3b7   : > { %1373 = vrot.lane.b32.xlu0 %v4030_v24, %s3529_s20  ;;  %s4334_s20 = sld [smem:[#allocation30_spill]] }
 0x3bd   : > { %p4336_p3 = scmp.ne.s32.totalorder %s4334_s20, 0 }
 0x3bf   : > { %p3405_p2 = pnand %p3404_p9, %p4336_p3 }
 0x3c1   : > { %p3406_p5 = pneg %p3405_p2 }
 0x422   : > { %v1863_v52 = vpop.xlane.xlu1 %1862 }
 0x423   : > { %vm1873_vm5 = vcmp.gt.f32.partialorder %v1863_v52, 0.0 }
 0x424   : > { %v1877_v53 = vsel %vm1873_vm5, %v1863_v52, 1.0 }
 0x425   : > { %3179 = vrcp.f32 %v1877_v53 }
 0x426   : > { %v1866_v54 = vpop.xlane.xlu0 %1865 }
 0x427   : > { %v1869_v55 = vpop.xlane.xlu1 %1868  ;;  %vm1874_vm6 = vcmp.gt.f32.partialorder %v1866_v54, 0.0 }
 0x428   : > { %vm1875_vm7 = vcmp.gt.f32.partialorder %v1869_v55, 0.0  ;;  %v1878_v58 = vsel %vm1874_vm6, %v1866_v54, 1.0 }
 0x429   : > { %v1879_v57 = vsel %vm1875_vm7, %v1869_v55, 1.0 }
 0x42a   : > { %3181 = vrcp.f32 %v1879_v57  ;;  %v1872_v59 = vpop.xlane.xlu0 %1871 }
 0x42b   : > { %v1377_v60 = vpop.permute.xlu1 %1376  ;;  %vm1876_vm8 = vcmp.gt.f32.partialorder %v1872_v59, 0.0  ;;  %3183 = vrcp.f32 %v1878_v58 }
 0x42c   : > { %v1880_v61 = vsel %vm1876_vm8, %v1872_v59, 1.0  ;;  %v1395_v62 = vcombine.low %v1371_v51, %v1377_v60  ;;  %v1396_v63 = vcombine.high %v1371_v51, %v1377_v60 }
 0x42d   : > { %3185 = vrcp.f32 %v1880_v61 }
 0x42e   : > { %v1374_v1 = vpop.permute.xlu0 %1373  ;;  %v1403_v4 = vrot.slane %v1395_v62, %v3946_v39  ;;  %v1410_v6 = vrot.slane %v1396_v63, %v3946_v39 }
 0x42f   : > { %v1379_v2 = vcombine.low %v4030_v24, %v1374_v1  ;;  %v1380_v3 = vcombine.high %v4030_v24, %v1374_v1 }
 0x431   : > { %v1387_v7 = vrot.slane %v1379_v2, %v3946_v39  ;;  %v1394_v8 = vrot.slane %v1380_v3, %v3946_v39 }
 0x432   : > { %v3180_v13 = vpop.eup %3179 }
 0x433   : > { %v1411_v9 = vcombine.low %v1387_v7, %v1403_v4  ;;  %v1412_v10 = vcombine.high %v1387_v7, %v1403_v4  ;;  %v1427_v11 = vcombine.low %v1394_v8, %v1410_v6  ;;  %v1428_v12 = vcombine.high %v1394_v8, %v1410_v6 }
 0x434   : > { %v1889_v23 = vmul.f32 %v3180_v13, %v1857_v38 }
 0x435   : > { %v1419_v14 = vrot.slane %v1411_v9, %v3948_v46  ;;  %v1426_v15 = vrot.slane %v1412_v10, %v3948_v46  ;;  %v1435_v16 = vrot.slane %v1427_v11, %v3948_v46  ;;  %v1442_v17 = vrot.slane %v1428_v12, %v3948_v46 }
 0x437   : > { %v3182_v18 = vpop.eup %3181  ;;  %v1447_v19 = vcombine.low %v1419_v14, %v1426_v15  ;;  %v2882_v20 = vcombine.high %v1419_v14, %v1426_v15  ;;  %v1463_v21 = vcombine.low %v1435_v16, %v1442_v17  ;;  %v2883_v22 = vcombine.high %v1435_v16, %v1442_v17 }
 0x438   : > { %v1891_v24 = vmul.f32 %v3182_v18, %v1859_v45  ;;  %v3184_v25 = vpop.eup %3183 }
 0x439   : > { %v1454_v26 = vrot.slane %v1447_v19, %v3946_v39  ;;  %v1462_v27 = vrot.slane %v2882_v20, %v3946_v39  ;;  %v1470_v28 = vrot.slane %v1463_v21, %v3946_v39  ;;  %v1478_v29 = vrot.slane %v2883_v22, %v3946_v39 }
 0x43a   : > { %v3186_v30 = vpop.eup %3185  ;;  %v1893_v31 = vcombine.low %v1889_v23, %v1891_v24  ;;  %v1894_v32 = vcombine.high %v1889_v23, %v1891_v24  ;;  %v1890_v37 = vmul.f32 %v3184_v25, %v4039_v43 }
 0x43b   : > { %v1479_v33 = vcombine.low %v1454_v26, %v1462_v27  ;;  %v1495_v34 = vcombine.low %v1470_v28, %v1478_v29  ;;  %v1480_v35 = vcombine.high %v1454_v26, %v1462_v27  ;;  %v1496_v36 = vcombine.high %v1470_v28, %v1478_v29 }
 0x43c   : > { %v1892_v38 = vmul.f32 %v3186_v30, %v1860_v49  ;;  %v1901_v51 = vrot.slane %v1893_v31, %v3946_v39  ;;  %v1908_v52 = vrot.slane %v1894_v32, %v3946_v39 }
 0x43d   : > { %v1487_v40 = vrot.slane %v1479_v33, %v3948_v46  ;;  %v1503_v41 = vrot.slane %v1495_v34, %v3948_v46  ;;  %v1494_v42 = vrot.slane %v1480_v35, %v3948_v46  ;;  %v1510_v44 = vrot.slane %v1496_v36, %v3948_v46 }
 0x43e   : > { %v1909_v45 = vcombine.low %v1890_v37, %v1892_v38  ;;  %v1910_v47 = vcombine.high %v1890_v37, %v1892_v38 }
 0x43f   : > { %v1511_v48 = vcombine.low %v1487_v40, %v1503_v41  ;;  %v1512_v50 = vcombine.high %v1487_v40, %v1503_v41  ;;  %v1513_v49 = vcombine.low %v1494_v42, %v1510_v44  ;;  %v1514_v54 = vcombine.high %v1494_v42, %v1510_v44  ;;  %v2494_v44 = vld [vmem:[#allocation14 + $0x18] sm:$0xff] }
 0x440   : > { %v1917_v53 = vrot.slane %v1909_v45, %v3946_v39  ;;  %v1924_v43 = vrot.slane %v1910_v47, %v3946_v39  ;;  %v2493_v45 = vld [vmem:[#allocation14 + $0x10] sm:$0xff] }
 0x441   : > { %3016 = vmatpush3.msra.mxu0 %v1511_v48  ;;  %3021 = vmatpush3.msra.mxu1 %v1512_v50 }
 0x442   : > { %3018 = vmatmul.mubr.msk.f32.vlgmr.msra.gmra.mxu0 %vm1515_vm2, %v1889_v23  ;;  %3023 = vmatmul.mubr.msk.f32.vlgmr.msra.gmra.mxu1 %vm1515_vm2, %v1890_v37  ;;  %v1925_v55 = vcombine.low %v1901_v51, %v1917_v53  ;;  %v1926_v57 = vcombine.high %v1901_v51, %v1917_v53  ;;  %v1941_v58 = vcombine.low %v1908_v52, %v1924_v43 }
 0x443   : > { %3025 = vmatprep.subr.mxu0 %v3525_v0  ;;  %3030 = vmatprep.subr.mxu1 %v3525_v0  ;;  %v1942_v59 = vcombine.high %v1908_v52, %v1924_v43 }
 0x444   : > { %3026 = vmatpush3.msra.mxu0 %v1513_v49  ;;  %3031 = vmatpush3.msra.mxu1 %v1514_v54  ;;  %v1933_v60 = vrot.slane %v1925_v55, %v3948_v46  ;;  %v1940_v61 = vrot.slane %v1926_v57, %v3948_v46  ;;  %v1949_v62 = vrot.slane %v1941_v58, %v3948_v46  ;;  %v2492_v54 = vld [vmem:[#allocation14 + $0x8] sm:$0xff] }
 0x445   : > { %3027 = vmatprep.mubr.msk.f32.mxu0 %vm3526_vm0, %v3525_v0  ;;  %3032 = vmatprep.mubr.msk.f32.mxu1 %vm3526_vm0, %v3525_v0  ;;  %v1956_v63 = vrot.slane %v1942_v59, %v3948_v46 }
 0x446   : > { %3028 = vmatmul.mubr.msk.f32.vlgmr.msra.gmra.mxu0 %vm1515_vm2, %v1891_v24  ;;  %3033 = vmatmul.mubr.msk.f32.vlgmr.msra.gmra.mxu1 %vm1515_vm2, %v1892_v38  ;;  %v1961_v1 = vcombine.low %v1933_v60, %v1940_v61  ;;  %v2892_v2 = vcombine.high %v1933_v60, %v1940_v61  ;;  %v2491_v60 = vld [vmem:[#allocation14] sm:$0xff] }
 0x447   : > { %3035 = vmatprep.subr.mxu0 %v3525_v0  ;;  %3043 = vmatprep.mubr.msk.f32.mxu0 %vm3526_vm0, %v3525_v0  ;;  %v1977_v3 = vcombine.low %v1949_v62, %v1956_v63  ;;  %v2893_v4 = vcombine.high %v1949_v62, %v1956_v63 }
 0x448   : > { %v1968_v6 = vrot.slane %v1961_v1, %v3946_v39  ;;  %v1976_v7 = vrot.slane %v2892_v2, %v3946_v39  ;;  %3036 = vmatpush3.msra.mxu0 %v2494_v44 }
 0x449   : > { %v1984_v8 = vrot.slane %v1977_v3, %v3946_v39  ;;  %v1992_v9 = vrot.slane %v2893_v4, %v3946_v39  ;;  %3037 = vmatprep.subr.mxu0 %v3525_v0 }
 0x44a   : > { %v1993_v10 = vcombine.low %v1968_v6, %v1976_v7  ;;  %v1994_v11 = vcombine.high %v1968_v6, %v1976_v7  ;;  %3038 = vmatpush3.msra.mxu0 %v2493_v45 }
 0x44b   : > { %v2009_v12 = vcombine.low %v1984_v8, %v1992_v9  ;;  %v2010_v13 = vcombine.high %v1984_v8, %v1992_v9  ;;  %3039 = vmatprep.subr.mxu0 %v3525_v0 }
 0x44c   : > { %v4098_v14 = vrot.slane %v1993_v10, %v3948_v46  ;;  %v4101_v15 = vrot.slane %v1994_v11, %v3948_v46  ;;  %3040 = vmatpush3.msra.mxu0 %v2492_v54  ;;  %v2872_v10 = vld [vmem:[%s4332_s10] ss:$0 sm:$0xff] }
 0x44d   : > { %v4104_v16 = vrot.slane %v2009_v12, %v3948_v46  ;;  %v4107_v17 = vrot.slane %v2010_v13, %v3948_v46  ;;  %3041 = vmatprep.subr.mxu0 %v3525_v0 }
 0x44e   : > { %3042 = vmatpush3.msra.mxu0 %v2491_v60 }
 0x44f   : > { %v2026_v18 = vcombine.high %v4098_v14, %v4104_v16  ;;  %v2028_v19 = vcombine.high %v4101_v15, %v4107_v17  ;;  %v2025_v20 = vcombine.low %v4098_v14, %v4104_v16  ;;  %v2027_v21 = vcombine.low %v4101_v15, %v4107_v17 }
 0x502   : > { %v2116_v22 = vpop.f32.mrf.mxu0  ;;  %v2189_v23 = vpop.f32.mrf.mxu1 }
 0x504   : > { %v3019_v24 = vpop.f32.mrf.mxu0  ;;  %v3024_v25 = vpop.f32.mrf.mxu1 }
 0x505   : > { %v2900_v25 = vld [vmem:[%s4333_s13] ss:$0 sm:$0xff] }
 0x506   : > { %v2262_v26 = vpop.f32.mrf.mxu0  ;;  %v2335_v27 = vpop.f32.mrf.mxu1 }
 0x507   : > { %v2339_v28 = vcombine.low %v2116_v22, %v2262_v26  ;;  %v2340_v29 = vcombine.high %v2116_v22, %v2262_v26  ;;  %v2355_v30 = vcombine.low %v2189_v23, %v2335_v27  ;;  %v2356_v31 = vcombine.high %v2189_v23, %v2335_v27 }
 0x508   : > { %v3029_v32 = vpop.f32.mrf.mxu0  ;;  %v3034_v33 = vpop.f32.mrf.mxu1 }
 0x509   : > { %v2347_v34 = vrot.slane %v2339_v28, %v3946_v39  ;;  %v2354_v35 = vrot.slane %v2340_v29, %v3946_v39  ;;  %v2363_v36 = vrot.slane %v2355_v30, %v3946_v39  ;;  %v2370_v37 = vrot.slane %v2356_v31, %v3946_v39 }
 0x50b   : > { %v2371_v38 = vcombine.low %v2347_v34, %v2363_v36  ;;  %v2372_v40 = vcombine.high %v2347_v34, %v2363_v36  ;;  %v2387_v41 = vcombine.low %v2354_v35, %v2370_v37  ;;  %v2388_v42 = vcombine.high %v2354_v35, %v2370_v37 }
 0x50d   : > { %v2379_v47 = vrot.slane %v2371_v38, %v3948_v46  ;;  %v2386_v48 = vrot.slane %v2372_v40, %v3948_v46  ;;  %v2395_v50 = vrot.slane %v2387_v41, %v3948_v46  ;;  %v2402_v51 = vrot.slane %v2388_v42, %v3948_v46 }
 0x50f   : > { %v2407_v52 = vcombine.low %v2379_v47, %v2386_v48  ;;  %v2898_v53 = vcombine.high %v2379_v47, %v2386_v48  ;;  %v2423_v43 = vcombine.low %v2395_v50, %v2402_v51  ;;  %v2899_v49 = vcombine.high %v2395_v50, %v2402_v51 }
 0x511   : > { %v2414_v55 = vrot.slane %v2407_v52, %v3946_v39  ;;  %v2422_v57 = vrot.slane %v2898_v53, %v3946_v39  ;;  %v2430_v58 = vrot.slane %v2423_v43, %v3946_v39  ;;  %v2438_v59 = vrot.slane %v2899_v49, %v3946_v39 }
 0x513   : > { %v2440_v61 = vcombine.high %v2414_v55, %v2422_v57  ;;  %v2456_v62 = vcombine.high %v2430_v58, %v2438_v59  ;;  %v2439_v63 = vcombine.low %v2414_v55, %v2422_v57  ;;  %v2455_v1 = vcombine.low %v2430_v58, %v2438_v59 }
 0x515   : > { %v2454_v2 = vrot.slane %v2440_v61, %v3948_v46  ;;  %v2470_v3 = vrot.slane %v2456_v62, %v3948_v46  ;;  %v2447_v4 = vrot.slane %v2439_v63, %v3948_v46  ;;  %v2463_v6 = vrot.slane %v2455_v1, %v3948_v46 }
 0x516   : > { %v906_v46 = vadd.f32 %v2872_v10, %v4004_v56 }
 0x517   : > { %v2473_v7 = vcombine.low %v2454_v2, %v2470_v3  ;;  %v2472_v8 = vcombine.high %v2447_v4, %v2463_v6  ;;  %v2471_v39 = vcombine.low %v2447_v4, %v2463_v6  ;;  %v2474_v0 = vcombine.high %v2454_v2, %v2470_v3 }
 0x519   : > { %2480 = vrot.lane.b32.xlu0 %v2473_v7, %s3533_s4  ;;  %2476 = vrot.lane.b32.xlu1 %v2472_v8, %s3534_s30 }
 0x51d   : > { %2484 = vrot.lane.b32.xlu1 %v2474_v0, %s3535_s22 }
 0x58b   : > { %v2477_v9 = vpop.permute.xlu1 %2476  ;;  %v2481_v11 = vpop.permute.xlu0 %2480 }
 0x58c   : > { %v2487_v12 = vsel %vm1515_vm2, %v2471_v39, %v2477_v9 }
 0x58d   : > { %v2488_v22 = vsel %vm2042_vm9, %v2487_v12, %v2481_v11 }
 0x58f   : > { %v2485_v13 = vpop.permute.xlu1 %2484 }
 0x590   : > { %v2489_v23 = vsel %vm2044_vm10, %v2488_v22, %v2485_v13 }
 0x591   : > { %v2490_v24 = vmul.f32 %v2489_v23, %v906_v46 }
 0x593   : > { %3044 = vmatmul.mubr.msk.f32.vlgmr.msra.gmra.mxu0 %vm754_vm1, %v2490_v24 }
 0x653   : > { %v2571_v26 = vpop.f32.mrf.mxu0 }
 0x654   : > { %v2572_v27 = vadd.f32 %v2900_v25, %v2571_v26 }
 0x655   : > { %v3045_v28 = vpop.f32.mrf.mxu0 }
 0x656   : > { %v2575_v29 = vadd.f32 %v2572_v27, %v3895_v5 }
 0x658   : > { %v2576_v56 = vsel %vm754_vm1, %v2575_v29, 0.0 }
 0x659   : > { %2577 = vadd.xlane.f32.xlu0 %v2576_v56 }
 0x66f   : > { %2030 = vrot.lane.b32.xlu0 %v2026_v18, %s3534_s30 }
 0x673   : > { %2038 = vrot.lane.b32.xlu0 %v2028_v19, %s3535_s22 }
 0x6e2   : > { %v2578_v30 = vpop.xlane.xlu0 %2577 }
 0x6e3   : > { %v2580_v31 = vmul.f32 0.03125, %v2578_v30 }
 0x6e5   : > { %v2581_v32 = vsub.f32 %v2575_v29, %v2580_v31 }
 0x6e6   : > { %v2031_v5 = vpop.permute.xlu0 %2030 }
 0x6e7   : > { %v2582_v33 = vmul.f32 %v2581_v32, %v2581_v32  ;;  %v2041_v36 = vsel %vm1515_vm2, %v2025_v20, %v2031_v5 }
 0x6e9   : > { %v2583_v34 = vsel %vm754_vm1, %v2582_v33, 0.0 }
 0x6ea   : > { %2584 = vadd.xlane.f32.xlu1 %v2583_v34  ;;  %v2039_v38 = vpop.permute.xlu0 %2038 }
 0x6fb   : > { %2034 = vrot.lane.b32.xlu1 %v2027_v21, %s3533_s4  ;;  %s3536_s4 = smov [#allocation17]  }
 0x6fc   : > { %s3407_s30 = sshll.u32 %s3536_s4, 4  ;;  %s3408_s30 = int_to_ptr.vmem [resolvable:$false] %s3407_s30 }
 0x6fd   : > { %s3409_s22 = scalar_lea.vmem %s3408_s30, 256  ;;  %p3410_p1 = scmp.lt.s32.totalorder %s2640_s23, %s3408_s30 }
 0x6fe   : > { %p3411_p8 = scmp.lt.s32.totalorder %s3409_s22, %s3403_s19 }
 0x700   : > { %p3412_p4 = por %p3411_p8, %p3410_p1 }
 0x702   : > { %p3413_p13 = pnand %p3412_p4, %p3406_p5 }
 0x773   : > { %v2585_v18 = vpop.xlane.xlu1 %2584 }
 0x774   : > { %v2586_v35 = vmul.f32 0.03125, %v2585_v18 }
 0x776   : > { %v2587_v19 = vadd.f32 1e-05, %v2586_v35 }
 0x777   : > { %v2035_v37 = vpop.permute.xlu1 %2034 }
 0x778   : > { %3187 = vrsqrt.f32 %v2587_v19  ;;  %v2043_v15 = vsel %vm2042_vm9, %v2041_v36, %v2035_v37 }
 0x779   : > { %v2045_v17 = vsel %vm2044_vm10, %v2043_v15, %v2039_v38 }
 0x77a   : > { %2046 = vst.msk [vmem:[%s731_s15] sm:$0xff] %vm754_vm1, %v2045_v17 }
 0x77b   : > { %3416 = shalt.err (!%p3413_p13)
}
 0x77c   : > { %s3417_s14 = scalar_lea.hbm %s4173_s17, 128  ;;  %s3421_s24 = scalar_lea.hbm %s4335_s18, 256 }
 0x77d   : > { %p3418_p10 = scmp.ne.s32.totalorder %s4173_s17, %s3417_s14  ;;  %p3422_p0 = scmp.lt.s32.totalorder %s4173_s17, %s4335_s18 }
 0x77e   : > { %p3423_p6 = scmp.lt.s32.totalorder %s3421_s24, %s3417_s14 }
 0x77f   : > { %p3419_p11 = pnand %p3418_p10, %p4336_p3 }
 0x780   : > { %p3424_p7 = por %p3423_p6, %p3422_p0 }
 0x781   : > { %p3420_p12 = pneg %p3419_p11 }
 0x783   : > { %p3425_p9 = pnand %p3424_p7, %p3420_p12 }
 0x785   : > { %3428 = shalt.err (!%p3425_p9)
}
 0x786   : > { %3073 = dma.vmem_to_hbm [thread:$0]  (%p4336_p3), %s2640_s23, 128, %s4173_s17, %s2613_s9   ;;  %v3188_v14 = vpop.eup %3187 }
 0x787   : > { %s4337_s28 = sld [smem:[#allocation41_spill]]  ;;  %v2589_v20 = vmul.f32 %v3188_v14, %v2581_v32  ;;  %s724_s22 = scalar_lea.vmem [#allocation16], %s3860_s1 }
 0x788   : > { %s4338_s30 = sld [smem:[#allocation42_spill]]  ;;  %s2626_s14 = sshll.u32 %s724_s22, 4  ;;  %s2627_s14 = int_to_ptr.vmem [resolvable:$true] %s2626_s14 }
 0x789   : > { %s4339_s24 = sld [smem:[#allocation43_spill]]  ;;  %s2608_s23 = scalar_lea.sflag [#allocation4], %s3857_s27 }
 0x78a   : > { %s3429_s17 = scalar_lea.vmem %s2627_s14, 128  ;;  %s3537_s9 = smov [#allocation16]  }
 0x78b   : > { %p3430_p2 = scmp.ne.s32.totalorder %s2627_s14, %s3429_s17  ;;  %s3433_s15 = sshll.u32 %s3537_s9, 4  ;;  %s3434_s15 = int_to_ptr.vmem [resolvable:$false] %s3433_s15 }
 0x78c   : > { %s3435_s1 = scalar_lea.vmem %s3434_s15, 256  ;;  %p3436_p8 = scmp.lt.s32.totalorder %s2627_s14, %s3434_s15 }
 0x78d   : > { %v2902_v16 = vld [vmem:[%s4337_s28] ss:$0 sm:$0xff]  ;;  %p3431_p5 = pnand %p3430_p2, %p4336_p3  ;;  %p3437_p4 = scmp.lt.s32.totalorder %s3435_s1, %s3429_s17 }
 0x78e   : > { %v2903_v21 = vld [vmem:[%s4338_s30] ss:$0 sm:$0xff]  ;;  %v2597_v40 = vmul.f32 %v2902_v16, %v2589_v20 }
 0x78f   : > { %s4340_s11 = smov %s4339_s24  ;;  %s2624_s13 = scalar_lea.hbm %s4339_s24, %s2906_s8 }
 0x790   : > { %v2605_v41 = vadd.f32 %v2903_v21, %v2597_v40  ;;  %p3432_p1 = pneg %p3431_p5  ;;  %p3438_p13 = por %p3437_p4, %p3436_p8 }
 0x792   : > { %2606 = vst.msk [vmem:[%s724_s22] sm:$0xff] %vm754_vm1, %v2605_v41  ;;  %p3439_p10 = pnand %p3438_p13, %p3432_p1 }
 0x794   : > { %3442 = shalt.err (!%p3439_p10)
}
 0x795   : > { %s3443_s0 = scalar_lea.hbm %s2624_s13, 128  ;;  %s3447_s6 = scalar_lea.hbm %s4340_s11, 256 }
 0x796   : > { %p3444_p11 = scmp.ne.s32.totalorder %s2624_s13, %s3443_s0  ;;  %p3448_p6 = scmp.lt.s32.totalorder %s2624_s13, %s4340_s11 }
 0x797   : > { %p3449_p7 = scmp.lt.s32.totalorder %s3447_s6, %s3443_s0 }
 0x798   : > { %p3445_p12 = pnand %p3444_p11, %p4336_p3 }
 0x799   : > { %p3450_p9 = por %p3449_p7, %p3448_p6 }
 0x79a   : > { %p3446_p0 = pneg %p3445_p12 }
 0x79c   : > { %p3451_p2 = pnand %p3450_p9, %p3446_p0 }
 0x79e   : > { %3454 = shalt.err (!%p3451_p2)
}
 0x79f   : > { %3072 = dma.vmem_to_hbm [thread:$0]  (%p4336_p3), %s2627_s14, 128, %s2624_s13, %s2608_s23  }
 0x7a0 PF: > { %s4341_s4 = sld [smem:[#allocation26_spill]] }
 0x7a1   : > { %s4342_s30 = sld [smem:[#allocation31_spill]] }
 0x7a2   : > { %s4343_s22 = sld [smem:[#allocation27_spill]] }
 0x7a6   : > { %s2651_s21 = sand.u32 1, %s4341_s4  }
 0x7a7   : > { %p4344_p5 = scmp.ne.s32.totalorder %s4342_s30, 0  ;;  %s2652_s10 = scalar_lea.sflag [#allocation4], %s2651_s21 }
 0x7a8   : > { %p4345_p1 = scmp.ge.s32.totalorder %s4343_s22, 2 }
 0x7aa   : > { %p3103_p8 = pnand %p4345_p1, %p4344_p5 }
 0x7ac   : > { %p3104_p4 = pneg %p3103_p8 }
 0x7ae   : > { %3492 = dma.done.wait (%p3104_p4), %s2652_s10, 128  }
 0x7af   : > { %3494 = vsyncadd (%p3104_p4), %s2652_s10, 4294967168  ;;  %s2661_s24 = scalar_lea.sflag [#allocation18], %s2651_s21 }
 0x7b0   : > { %3496 = dma.done.wait (%p3104_p4), %s2661_s24, 128  }
 0x7b1   : > { %3498 = vsyncadd (%p3104_p4), %s2661_s24, 4294967168  ;;  %s4346_s27 = sld [smem:[#allocation28_spill]]  ;;  %s4348_s24 = smov %s3505_s25 }
 0x7b2   : > { %s4347_s20 = sld [smem:[#allocation29_spill]]  ;;  %s4349_s25 = smov %s3509_s26 }
 0x7b7   : > { %p40_p3 = scmp.ge.s32.totalorder %s4346_s27, 4  }
 0x7b8   : > { %s4350_s26 = smov %s4347_s20 }
 0x7b9   :  { %42 = sbr.rel (!%p40_p3) target bundleno = 26 (0x1a), region = 193 }
 0x7be   :  { %2666 = vsyncpa [#allocation3], 1 }
 0x7bf   :  { %2668 = vsyncpa [#allocation3 + $0x1], 1 }
 0x7c0   :  { %2669 = vsyncpa [#allocation6], 1 }
 0x7c1   :  { %2671 = vsyncpa [#allocation6 + $0x1], 1 }
 0x7c2   :  { %2672 = vsyncpa [#allocation9], 1 }
 0x7c3   :  { %2673 = vsyncpa [#allocation12], 1 }
 0x7c4   :  { %2674 = vsyncpa [#allocation15], 1 }
 0x7c5   :  { %2675 = vsyncpa [#allocation4], 1 }
 0x7c6   :  { %2677 = vsyncpa [#allocation4 + $0x1], 1 }
 0x7c7   :  { %2678 = vsyncpa [#allocation18], 1 }
 0x7c8   :  { %2680 = vsyncpa [#allocation18 + $0x1], 1 }

</bundles_post_ra>
